<compile_context>
chip_gen: v7x
topology: tpu7x:2x2x1
jax: 0.10.0
libtpu: 0.0.40
codegen_flags: <defaults>
</compile_context>

<pallas_src>
from functools import lru_cache

import jax
import jax.numpy as jnp
from jax.experimental import pallas as pl
from jax.experimental.pallas import tpu as pltpu

# ----- small synthetic BERT config (input_dim = HIDDEN, vocab_size = VOCAB) -----
HIDDEN = 32
VOCAB = 32
NUM_HEADS = 2
HEAD_DIM = HIDDEN // NUM_HEADS
INTERMEDIATE = 64
NUM_LAYERS = 2
MAX_POS = 16
LN_EPS = 1e-12
NEG_INF = -1000000000.0          # same constant as the PyTorch module
SLAB_LANES = 128                 # lane-dense slab width

VMEM_SPEC = pl.BlockSpec(memory_space=pltpu.MemorySpace.VMEM)


# ---------------------------------------------------------------------------
# Slab layout: every block lives at an 8-aligned row offset, padded to 128 lanes
# ---------------------------------------------------------------------------

def _round8(n):
    return ((n + 7) // 8) * 8


def _slab_layout(B, S):
    M = B * S
    order = [
        ("word_emb", VOCAB, HIDDEN),
        ("pos_type", M, HIDDEN),          # tiled positional + token-type embedding
        ("attn_bias", M, M),              # causal + batch-block + padding additive bias
        ("emb_ln_g", 1, HIDDEN),
        ("emb_ln_b", 1, HIDDEN),
    ]
    for l in range(NUM_LAYERS):
        order += [
            (f"wqkv{l}", HIDDEN, 3 * HIDDEN),
            (f"bqkv{l}", 1, 3 * HIDDEN),
            (f"wo{l}", HIDDEN, HIDDEN),
            (f"bo{l}", 1, HIDDEN),
            (f"ln1_g{l}", 1, HIDDEN),
            (f"ln1_b{l}", 1, HIDDEN),
            (f"wi{l}", HIDDEN, INTERMEDIATE),
            (f"bi{l}", 1, INTERMEDIATE),
            (f"wo2{l}", INTERMEDIATE, HIDDEN),
            (f"bo2{l}", 1, HIDDEN),
            (f"ln2_g{l}", 1, HIDDEN),
            (f"ln2_b{l}", 1, HIDDEN),
        ]
    order += [("cls_w", HIDDEN, VOCAB), ("cls_b", 1, VOCAB)]

    layout, off = {}, 0
    for name, r, c in order:
        assert c <= SLAB_LANES, f"block {name} wider than one lane tile"
        layout[name] = (off, r, c)
        off += _round8(r)
    return layout, off, order


def _pack_slab(params, pos_type, attn_bias, B, S):
    """Concatenate every block (zero-padded to 128 lanes) into one f32 slab."""
    layout, total_rows, order = _slab_layout(B, S)
    tensors = {
        "word_emb": params["word_emb"],
        "pos_type": pos_type,
        "attn_bias": attn_bias,
        "emb_ln_g": params["emb_ln_g"], "emb_ln_b": params["emb_ln_b"],
        "cls_w": params["cls_w"], "cls_b": params["cls_b"],
    }
    for l in range(NUM_LAYERS):
        for nm in ("wqkv", "bqkv", "wo", "bo", "ln1_g", "ln1_b",
                   "wi", "bi", "wo2", "bo2", "ln2_g", "ln2_b"):
            tensors[f"{nm}{l}"] = params[nm][l]

    pieces = []
    for name, r, c in order:
        a = tensors[name].astype(jnp.float32).reshape(r, c)
        pieces.append(jnp.pad(a, ((0, _round8(r) - r), (0, SLAB_LANES - c))))
    slab = jnp.concatenate(pieces, axis=0)
    assert slab.shape == (total_rows, SLAB_LANES)
    return slab


# ---------------------------------------------------------------------------
# In-kernel helpers (operate on traced values)
# ---------------------------------------------------------------------------

def _layer_norm(x, g, b):
    mu = jnp.mean(x, axis=-1, keepdims=True)
    xc = x - mu
    var = jnp.mean(xc * xc, axis=-1, keepdims=True)
    return xc * jax.lax.rsqrt(var + LN_EPS) * g + b


def _gelu(y):
    # tanh-approx GELU (BERT gelu); tanh runs on the EUP
    return 0.5 * y * (1.0 + jnp.tanh(0.7978845608028654 * (y + 0.044715 * y * y * y)))


# ---------------------------------------------------------------------------
# Fused kernels (one pallas_call per forward, everything resident in VMEM)
# ---------------------------------------------------------------------------

@lru_cache(maxsize=None)
def _make_kernels(B, S):
    layout, _, _ = _slab_layout(B, S)
    M = B * S
    scale = 1.0 / (HEAD_DIM ** 0.5)

    def blk(slab_ref, name):
        off, r, c = layout[name]
        return slab_ref[off:off + r, 0:c]        # static slice: free

    def forward_logits(tok_ref, slab_ref):
        # ---- embeddings: one-hot token lookup as a matmul (gather-free) ----
        ids = tok_ref[:, 0:1]                                             # (M, 1) int32
        onehot = (jax.lax.broadcasted_iota(jnp.int32, (M, VOCAB), 1) == ids
                  ).astype(jnp.float32)
        h = jnp.dot(onehot, blk(slab_ref, "word_emb"),
                    preferred_element_type=jnp.float32)                   # (M, H)
        h = h + blk(slab_ref, "pos_type")                                 # precomputed host-side
        h = _layer_norm(h, blk(slab_ref, "emb_ln_g"), blk(slab_ref, "emb_ln_b"))

        # Precomputed (M, M) additive bias: causal + batch-block-diagonal + key padding.
        # TODO(synk): HF BertModel's exact get_extended_attention_mask internals are
        # approximated as causal mask (is_decoder=True) + user additive key bias.
        attn_bias = blk(slab_ref, "attn_bias")                            # (M, M)

        for l in range(NUM_LAYERS):
            # fused QKV projection: one (H, 3H) matmul
            qkv = jnp.dot(h, blk(slab_ref, f"wqkv{l}"),
                          preferred_element_type=jnp.float32) + blk(slab_ref, f"bqkv{l}")

            heads = []
            for hd in range(NUM_HEADS):
                q = qkv[:, hd * HEAD_DIM:(hd + 1) * HEAD_DIM]                       # (M, Dh)
                k = qkv[:, HIDDEN + hd * HEAD_DIM: HIDDEN + (hd + 1) * HEAD_DIM]
                v = qkv[:, 2 * HIDDEN + hd * HEAD_DIM: 2 * HIDDEN + (hd + 1) * HEAD_DIM]
                # One (M, M) score matmul covers every batch; invalid pairs get -1e9.
                s = jax.lax.dot_general(q, k, (((1,), (1,)), ((), ())),
                                        preferred_element_type=jnp.float32)
                s = s * scale + attn_bias                                           # (M, M)
                m = jnp.max(s, axis=-1, keepdims=True)
                e = jnp.exp(s - m)
                p = e * pl.reciprocal(jnp.sum(e, axis=-1, keepdims=True), approx=True)
                heads.append(jnp.dot(p, v, preferred_element_type=jnp.float32))     # (M, Dh)
            ctx = jnp.concatenate(heads, axis=-1)                                   # (M, H)

            attn_out = jnp.dot(ctx, blk(slab_ref, f"wo{l}"),
                               preferred_element_type=jnp.float32) + blk(slab_ref, f"bo{l}")
            h = _layer_norm(attn_out + h,
                            blk(slab_ref, f"ln1_g{l}"), blk(slab_ref, f"ln1_b{l}"))
            inter = _gelu(jnp.dot(h, blk(slab_ref, f"wi{l}"),
                                  preferred_element_type=jnp.float32) + blk(slab_ref, f"bi{l}"))
            ffn = jnp.dot(inter, blk(slab_ref, f"wo2{l}"),
                          preferred_element_type=jnp.float32) + blk(slab_ref, f"bo2{l}")
            h = _layer_norm(ffn + h,
                            blk(slab_ref, f"ln2_g{l}"), blk(slab_ref, f"ln2_b{l}"))

        return jnp.dot(h, blk(slab_ref, "cls_w"),
                       preferred_element_type=jnp.float32) + blk(slab_ref, "cls_b")

    def probs_kernel(tok_ref, slab_ref, probs_ref):
        logits = forward_logits(tok_ref, slab_ref)
        m = jnp.max(logits, axis=-1, keepdims=True)
        e = jnp.exp(logits - m)
        probs_ref[...] = e / jnp.sum(e, axis=-1, keepdims=True)           # exact divide

    def loss_kernel(tok_ref, slab_ref, loss_ref):
        logits = forward_logits(tok_ref, slab_ref)
        labels = tok_ref[:, 1:2]                                          # (M, 1) int32
        m = jnp.max(logits, axis=-1, keepdims=True)
        lse = m + jnp.log(jnp.sum(jnp.exp(logits - m), axis=-1, keepdims=True))
        vid = jax.lax.broadcasted_iota(jnp.int32, (M, VOCAB), 1)
        correct = jnp.sum(jnp.where(vid == labels, logits, 0.0),
                          axis=-1, keepdims=True)                         # (M, 1)
        valid = (labels != -100).astype(jnp.float32)                      # (M, 1)
        per_tok = (lse - correct) * valid
        loss_sum = jnp.sum(per_tok, axis=0, keepdims=True)                # (1, 1)
        cnt = jnp.sum(valid, axis=0, keepdims=True)                       # (1, 1)
        # NaN guard: PyTorch returns NaN if every label is ignored; we return 0.0.
        loss_ref[...] = loss_sum / jnp.maximum(cnt, 1.0)

    return probs_kernel, loss_kernel


def _cost_estimate(B, S, slab_rows):
    M = B * S
    flops = 2 * M * VOCAB * HIDDEN                                    # embedding matmul
    flops += NUM_LAYERS * (2 * M * HIDDEN * 3 * HIDDEN                # fused QKV
                           + NUM_HEADS * 4 * M * M * HEAD_DIM         # scores + ctx
                           + 2 * M * HIDDEN * HIDDEN                  # attn out proj
                           + 4 * M * HIDDEN * INTERMEDIATE)           # FFN in + out
    flops += 2 * M * HIDDEN * VOCAB                                   # cls head
    transcendentals = NUM_LAYERS * (NUM_HEADS * M * M + M * INTERMEDIATE) + 2 * M * VOCAB
    bytes_accessed = 4 * (slab_rows * SLAB_LANES + 2 * M + M * VOCAB + 1)
    return pl.CostEstimate(flops=flops, transcendentals=transcendentals,
                           bytes_accessed=bytes_accessed)


# ---------------------------------------------------------------------------
# Parameters (deterministic synthetic init; no checkpoint load)
# ---------------------------------------------------------------------------

def init_params(key):
    def nrm(k, shape, scale=0.02):
        return (scale * jax.random.normal(k, shape)).astype(jnp.float32)

    ks = jax.random.split(key, 8)
    L, H, I, V = NUM_LAYERS, HIDDEN, INTERMEDIATE, VOCAB
    return {
        "word_emb": nrm(ks[0], (V, H)),
        "pos_emb": nrm(ks[1], (MAX_POS, H)),
        "type_emb": nrm(ks[2], (2, H)),
        "emb_ln_g": jnp.ones((1, H), jnp.float32),
        "emb_ln_b": jnp.zeros((1, H), jnp.float32),
        "wqkv": nrm(ks[3], (L, H, 3 * H)),
        "bqkv": jnp.zeros((L, 1, 3 * H), jnp.float32),
        "wo": nrm(ks[4], (L, H, H)),
        "bo": jnp.zeros((L, 1, H), jnp.float32),
        "ln1_g": jnp.ones((L, 1, H), jnp.float32),
        "ln1_b": jnp.zeros((L, 1, H), jnp.float32),
        "wi": nrm(ks[5], (L, H, I)),
        "bi": jnp.zeros((L, 1, I), jnp.float32),
        "wo2": nrm(ks[6], (L, I, H)),
        "bo2": jnp.zeros((L, 1, H), jnp.float32),
        "ln2_g": jnp.ones((L, 1, H), jnp.float32),
        "ln2_b": jnp.zeros((L, 1, H), jnp.float32),
        "cls_w": nrm(ks[7], (H, V)),
        "cls_b": jnp.zeros((1, V), jnp.float32),
    }


# ---------------------------------------------------------------------------
# Model forward: a single pallas_call per invocation (2 operands, 1 output)
# ---------------------------------------------------------------------------

def language_model_forward(params, x, y=None, attention_mask=None):
    """x: (B, S) int32 token ids. Mirrors LanguageModel.forward."""
    B, S = x.shape
    M = B * S
    assert S <= MAX_POS, "sequence length exceeds MAX_POS"
    assert M <= SLAB_LANES, "B*S must fit one lane tile for the fused attention bias"

    if attention_mask is None:
        attention_mask = jnp.ones((B, S), jnp.float32)
    key_bias = (1.0 - attention_mask.astype(jnp.float32)) * NEG_INF          # (B, S)

    # Host-side precompute (fuses into one small XLA op under jit):
    #   (M, M) additive attention bias = causal & same-batch allowed + key padding bias
    bidx = jnp.repeat(jnp.arange(B), S)                                      # (M,)
    spos = jnp.tile(jnp.arange(S), B)                                        # (M,)
    allowed = (bidx[:, None] == bidx[None, :]) & (spos[None, :] <= spos[:, None])
    attn_bias = jnp.where(allowed, 0.0, NEG_INF) + key_bias.reshape(1, M)    # (M, M)
    #   position + token-type embedding slab (token_type_ids assumed all-zero)
    pos_type = jnp.tile(params["pos_emb"][:S], (B, 1)) + params["type_emb"][0:1]  # (M, H)

    slab = _pack_slab(params, pos_type, attn_bias, B, S)                     # (rows, 128) f32
    slab_rows = slab.shape[0]

    labels = (y if y is not None else jnp.zeros((B, S), jnp.int32))
    tok = jnp.stack([x.reshape(M).astype(jnp.int32),
                     labels.reshape(M).astype(jnp.int32)], axis=1)           # (M, 2)

    probs_kernel, loss_kernel = _make_kernels(B, S)
    cost = _cost_estimate(B, S, slab_rows)

    if y is not None:
        loss = pl.pallas_call(
            loss_kernel,
            out_shape=jax.ShapeDtypeStruct((1, 1), jnp.float32),
            in_specs=[VMEM_SPEC, VMEM_SPEC],
            out_specs=VMEM_SPEC,
            cost_estimate=cost,
        )(tok, slab)
        return loss[0, 0]

    probs = pl.pallas_call(
        probs_kernel,
        out_shape=jax.ShapeDtypeStruct((M, VOCAB), jnp.float32),
        in_specs=[VMEM_SPEC, VMEM_SPEC],
        out_specs=VMEM_SPEC,
        cost_estimate=cost,
    )(tok, slab)
    return probs.reshape(B, S, VOCAB)


# ---------------------------------------------------------------------------

if __name__ == "__main__":
    B, S = 2, 8
    root = jax.random.PRNGKey(0)
    kp, kx, ky = jax.random.split(root, 3)

    params = init_params(kp)
    input_ids = jax.random.randint(kx, (B, S), 0, VOCAB, dtype=jnp.int32)
    attention_mask = jnp.ones((B, S), jnp.float32).at[1, S - 2:].set(0.0)   # pad tail of seq 1

    # inference path: softmax over vocab
    infer_fn = jax.jit(lambda p, xi, m: language_model_forward(p, xi, attention_mask=m))
    probs = jax.block_until_ready(infer_fn(params, input_ids, attention_mask))
    assert probs.shape == (B, S, VOCAB)
    assert bool(jnp.all(jnp.isfinite(probs)))

    # training path: cross-entropy with ignore_index=-100
    y = jax.random.randint(ky, (B, S), 0, VOCAB, dtype=jnp.int32)
    y = y.at[1, S - 2:].set(-100)
    loss_fn = jax.jit(lambda p, xi, yy, m: language_model_forward(p, xi, y=yy, attention_mask=m))
    loss = jax.block_until_ready(loss_fn(params, input_ids, y, attention_mask))
    assert loss.shape == ()
    assert bool(jnp.isfinite(loss))

    print("KERNEL_OK")
</pallas_src>

<mosaic_0001>
module attributes {stable_mosaic.version = 11 : i64} {
  func.func @probs_kernel(%arg0: memref<16x2xi32, #tpu.memory_space<vmem>>, %arg1: memref<568x128xf32, #tpu.memory_space<vmem>>, %arg2: memref<16x32xf32, #tpu.memory_space<vmem>>) attributes {dimension_semantics = [], scalar_prefetch = 0 : i64, scratch_operands = 0 : i64, tpu.core_type = #tpu.core_type<tc>} {
    %c0 = arith.constant 0 : index
    %c0_0 = arith.constant 0 : index
    %0 = vector.load %arg0[%c0, %c0_0] : memref<16x2xi32, #tpu.memory_space<vmem>>, vector<16x1xi32>
    %1 = tpu.iota {dimensions = array<i32: 1>} : vector<16x32xi32>
    %2 = vector.broadcast %0 : vector<16x1xi32> to vector<16x32xi32>
    %3 = arith.cmpi eq, %1, %2 : vector<16x32xi32>
    %4 = arith.extui %3 : vector<16x32xi1> to vector<16x32xi32>
    %5 = arith.sitofp %4 : vector<16x32xi32> to vector<16x32xf32>
    %c0_1 = arith.constant 0 : index
    %c0_2 = arith.constant 0 : index
    %6 = vector.load %arg1[%c0_1, %c0_2] : memref<568x128xf32, #tpu.memory_space<vmem>>, vector<32x32xf32>
    %cst = arith.constant dense<0.000000e+00> : vector<16x32xf32>
    %7 = tpu.matmul %5, %6, %cst {dimension_numbers = #tpu.dot_dimension_numbers<[1], [0], [0], [1], [0, 0, 1, 1], [], []>} : vector<16x32xf32>, vector<32x32xf32>, vector<16x32xf32> -> vector<16x32xf32>
    %c32 = arith.constant 32 : index
    %c0_3 = arith.constant 0 : index
    %8 = vector.load %arg1[%c32, %c0_3] : memref<568x128xf32, #tpu.memory_space<vmem>>, vector<16x32xf32>
    %9 = arith.addf %7, %8 : vector<16x32xf32>
    %c64 = arith.constant 64 : index
    %c0_4 = arith.constant 0 : index
    %10 = vector.load %arg1[%c64, %c0_4] : memref<568x128xf32, #tpu.memory_space<vmem>>, vector<1x32xf32>
    %c72 = arith.constant 72 : index
    %c0_5 = arith.constant 0 : index
    %11 = vector.load %arg1[%c72, %c0_5] : memref<568x128xf32, #tpu.memory_space<vmem>>, vector<1x32xf32>
    %cst_6 = arith.constant dense<0.000000e+00> : vector<16xf32>
    %12 = vector.multi_reduction <add>, %9, %cst_6 [1] : vector<16x32xf32> to vector<16xf32>
    %13 = vector.shape_cast %12 : vector<16xf32> to vector<16x1xf32>
    %cst_7 = arith.constant 3.200000e+01 : f32
    %14 = vector.broadcast %cst_7 : f32 to vector<16x1xf32>
    %15 = arith.divf %13, %14 : vector<16x1xf32>
    %16 = vector.broadcast %15 : vector<16x1xf32> to vector<16x32xf32>
    %17 = arith.subf %9, %16 : vector<16x32xf32>
    %18 = arith.mulf %17, %17 : vector<16x32xf32>
    %cst_8 = arith.constant dense<0.000000e+00> : vector<16xf32>
    %19 = vector.multi_reduction <add>, %18, %cst_8 [1] : vector<16x32xf32> to vector<16xf32>
    %20 = vector.shape_cast %19 : vector<16xf32> to vector<16x1xf32>
    %cst_9 = arith.constant 3.200000e+01 : f32
    %21 = vector.broadcast %cst_9 : f32 to vector<16x1xf32>
    %22 = arith.divf %20, %21 : vector<16x1xf32>
    %cst_10 = arith.constant 9.99999996E-13 : f32
    %23 = vector.broadcast %cst_10 : f32 to vector<16x1xf32>
    %24 = arith.addf %22, %23 : vector<16x1xf32>
    %25 = math.rsqrt %24 : vector<16x1xf32>
    %26 = vector.broadcast %25 : vector<16x1xf32> to vector<16x32xf32>
    %27 = arith.mulf %17, %26 : vector<16x32xf32>
    %28 = vector.broadcast %10 : vector<1x32xf32> to vector<16x32xf32>
    %29 = arith.mulf %27, %28 : vector<16x32xf32>
    %30 = vector.broadcast %11 : vector<1x32xf32> to vector<16x32xf32>
    %31 = arith.addf %29, %30 : vector<16x32xf32>
    %c48 = arith.constant 48 : index
    %c0_11 = arith.constant 0 : index
    %32 = vector.load %arg1[%c48, %c0_11] : memref<568x128xf32, #tpu.memory_space<vmem>>, vector<16x16xf32>
    %c80 = arith.constant 80 : index
    %c0_12 = arith.constant 0 : index
    %33 = vector.load %arg1[%c80, %c0_12] : memref<568x128xf32, #tpu.memory_space<vmem>>, vector<32x96xf32>
    %cst_13 = arith.constant dense<0.000000e+00> : vector<16x96xf32>
    %34 = tpu.matmul %31, %33, %cst_13 {dimension_numbers = #tpu.dot_dimension_numbers<[1], [0], [0], [1], [0, 0, 1, 1], [], []>} : vector<16x32xf32>, vector<32x96xf32>, vector<16x96xf32> -> vector<16x96xf32>
    %c112 = arith.constant 112 : index
    %c0_14 = arith.constant 0 : index
    %35 = vector.load %arg1[%c112, %c0_14] : memref<568x128xf32, #tpu.memory_space<vmem>>, vector<1x96xf32>
    %36 = vector.broadcast %35 : vector<1x96xf32> to vector<16x96xf32>
    %37 = arith.addf %34, %36 : vector<16x96xf32>
    %38 = vector.extract_strided_slice %37 {offsets = [0, 0], sizes = [16, 16], strides = [1, 1]} : vector<16x96xf32> to vector<16x16xf32>
    %39 = vector.extract_strided_slice %37 {offsets = [0, 32], sizes = [16, 16], strides = [1, 1]} : vector<16x96xf32> to vector<16x16xf32>
    %40 = vector.extract_strided_slice %37 {offsets = [0, 64], sizes = [16, 16], strides = [1, 1]} : vector<16x96xf32> to vector<16x16xf32>
    %cst_15 = arith.constant dense<0.000000e+00> : vector<16x16xf32>
    %41 = tpu.matmul %38, %39, %cst_15 {dimension_numbers = #tpu.dot_dimension_numbers<[1], [1], [0], [0], [0, 0, 1, 0], [], []>} : vector<16x16xf32>, vector<16x16xf32>, vector<16x16xf32> -> vector<16x16xf32>
    %cst_16 = arith.constant 2.500000e-01 : f32
    %42 = vector.broadcast %cst_16 : f32 to vector<16x16xf32>
    %43 = arith.mulf %41, %42 : vector<16x16xf32>
    %44 = arith.addf %43, %32 : vector<16x16xf32>
    %cst_17 = arith.constant dense<0xFF800000> : vector<16xf32>
    %45 = vector.multi_reduction <maximumf>, %44, %cst_17 [1] : vector<16x16xf32> to vector<16xf32>
    %46 = vector.shape_cast %45 : vector<16xf32> to vector<16x1xf32>
    %47 = vector.broadcast %46 : vector<16x1xf32> to vector<16x16xf32>
    %48 = arith.subf %44, %47 : vector<16x16xf32>
    %49 = math.exp %48 : vector<16x16xf32>
    %cst_18 = arith.constant dense<0.000000e+00> : vector<16xf32>
    %50 = vector.multi_reduction <add>, %49, %cst_18 [1] : vector<16x16xf32> to vector<16xf32>
    %51 = vector.shape_cast %50 : vector<16xf32> to vector<16x1xf32>
    %52 = tpu.reciprocal %51 {approx = true} : vector<16x1xf32> -> vector<16x1xf32>
    %53 = vector.broadcast %52 : vector<16x1xf32> to vector<16x16xf32>
    %54 = arith.mulf %49, %53 : vector<16x16xf32>
    %cst_19 = arith.constant dense<0.000000e+00> : vector<16x16xf32>
    %55 = tpu.matmul %54, %40, %cst_19 {dimension_numbers = #tpu.dot_dimension_numbers<[1], [0], [0], [1], [0, 0, 1, 1], [], []>} : vector<16x16xf32>, vector<16x16xf32>, vector<16x16xf32> -> vector<16x16xf32>
    %56 = vector.extract_strided_slice %37 {offsets = [0, 16], sizes = [16, 16], strides = [1, 1]} : vector<16x96xf32> to vector<16x16xf32>
    %57 = vector.extract_strided_slice %37 {offsets = [0, 48], sizes = [16, 16], strides = [1, 1]} : vector<16x96xf32> to vector<16x16xf32>
    %58 = vector.extract_strided_slice %37 {offsets = [0, 80], sizes = [16, 16], strides = [1, 1]} : vector<16x96xf32> to vector<16x16xf32>
    %cst_20 = arith.constant dense<0.000000e+00> : vector<16x16xf32>
    %59 = tpu.matmul %56, %57, %cst_20 {dimension_numbers = #tpu.dot_dimension_numbers<[1], [1], [0], [0], [0, 0, 1, 0], [], []>} : vector<16x16xf32>, vector<16x16xf32>, vector<16x16xf32> -> vector<16x16xf32>
    %cst_21 = arith.constant 2.500000e-01 : f32
    %60 = vector.broadcast %cst_21 : f32 to vector<16x16xf32>
    %61 = arith.mulf %59, %60 : vector<16x16xf32>
    %62 = arith.addf %61, %32 : vector<16x16xf32>
    %cst_22 = arith.constant dense<0xFF800000> : vector<16xf32>
    %63 = vector.multi_reduction <maximumf>, %62, %cst_22 [1] : vector<16x16xf32> to vector<16xf32>
    %64 = vector.shape_cast %63 : vector<16xf32> to vector<16x1xf32>
    %65 = vector.broadcast %64 : vector<16x1xf32> to vector<16x16xf32>
    %66 = arith.subf %62, %65 : vector<16x16xf32>
    %67 = math.exp %66 : vector<16x16xf32>
    %cst_23 = arith.constant dense<0.000000e+00> : vector<16xf32>
    %68 = vector.multi_reduction <add>, %67, %cst_23 [1] : vector<16x16xf32> to vector<16xf32>
    %69 = vector.shape_cast %68 : vector<16xf32> to vector<16x1xf32>
    %70 = tpu.reciprocal %69 {approx = true} : vector<16x1xf32> -> vector<16x1xf32>
    %71 = vector.broadcast %70 : vector<16x1xf32> to vector<16x16xf32>
    %72 = arith.mulf %67, %71 : vector<16x16xf32>
    %cst_24 = arith.constant dense<0.000000e+00> : vector<16x16xf32>
    %73 = tpu.matmul %72, %58, %cst_24 {dimension_numbers = #tpu.dot_dimension_numbers<[1], [0], [0], [1], [0, 0, 1, 1], [], []>} : vector<16x16xf32>, vector<16x16xf32>, vector<16x16xf32> -> vector<16x16xf32>
    %74 = tpu.concatenate %55, %73 in 1 : vector<16x16xf32>, vector<16x16xf32> -> vector<16x32xf32>
    %c120 = arith.constant 120 : index
    %c0_25 = arith.constant 0 : index
    %75 = vector.load %arg1[%c120, %c0_25] : memref<568x128xf32, #tpu.memory_space<vmem>>, vector<32x32xf32>
    %cst_26 = arith.constant dense<0.000000e+00> : vector<16x32xf32>
    %76 = tpu.matmul %74, %75, %cst_26 {dimension_numbers = #tpu.dot_dimension_numbers<[1], [0], [0], [1], [0, 0, 1, 1], [], []>} : vector<16x32xf32>, vector<32x32xf32>, vector<16x32xf32> -> vector<16x32xf32>
    %c152 = arith.constant 152 : index
    %c0_27 = arith.constant 0 : index
    %77 = vector.load %arg1[%c152, %c0_27] : memref<568x128xf32, #tpu.memory_space<vmem>>, vector<1x32xf32>
    %78 = vector.broadcast %77 : vector<1x32xf32> to vector<16x32xf32>
    %79 = arith.addf %76, %78 : vector<16x32xf32>
    %80 = arith.addf %79, %31 : vector<16x32xf32>
    %c160 = arith.constant 160 : index
    %c0_28 = arith.constant 0 : index
    %81 = vector.load %arg1[%c160, %c0_28] : memref<568x128xf32, #tpu.memory_space<vmem>>, vector<1x32xf32>
    %c168 = arith.constant 168 : index
    %c0_29 = arith.constant 0 : index
    %82 = vector.load %arg1[%c168, %c0_29] : memref<568x128xf32, #tpu.memory_space<vmem>>, vector<1x32xf32>
    %cst_30 = arith.constant dense<0.000000e+00> : vector<16xf32>
    %83 = vector.multi_reduction <add>, %80, %cst_30 [1] : vector<16x32xf32> to vector<16xf32>
    %84 = vector.shape_cast %83 : vector<16xf32> to vector<16x1xf32>
    %cst_31 = arith.constant 3.200000e+01 : f32
    %85 = vector.broadcast %cst_31 : f32 to vector<16x1xf32>
    %86 = arith.divf %84, %85 : vector<16x1xf32>
    %87 = vector.broadcast %86 : vector<16x1xf32> to vector<16x32xf32>
    %88 = arith.subf %80, %87 : vector<16x32xf32>
    %89 = arith.mulf %88, %88 : vector<16x32xf32>
    %cst_32 = arith.constant dense<0.000000e+00> : vector<16xf32>
    %90 = vector.multi_reduction <add>, %89, %cst_32 [1] : vector<16x32xf32> to vector<16xf32>
    %91 = vector.shape_cast %90 : vector<16xf32> to vector<16x1xf32>
    %cst_33 = arith.constant 3.200000e+01 : f32
    %92 = vector.broadcast %cst_33 : f32 to vector<16x1xf32>
    %93 = arith.divf %91, %92 : vector<16x1xf32>
    %cst_34 = arith.constant 9.99999996E-13 : f32
    %94 = vector.broadcast %cst_34 : f32 to vector<16x1xf32>
    %95 = arith.addf %93, %94 : vector<16x1xf32>
    %96 = math.rsqrt %95 : vector<16x1xf32>
    %97 = vector.broadcast %96 : vector<16x1xf32> to vector<16x32xf32>
    %98 = arith.mulf %88, %97 : vector<16x32xf32>
    %99 = vector.broadcast %81 : vector<1x32xf32> to vector<16x32xf32>
    %100 = arith.mulf %98, %99 : vector<16x32xf32>
    %101 = vector.broadcast %82 : vector<1x32xf32> to vector<16x32xf32>
    %102 = arith.addf %100, %101 : vector<16x32xf32>
    %c176 = arith.constant 176 : index
    %c0_35 = arith.constant 0 : index
    %103 = vector.load %arg1[%c176, %c0_35] : memref<568x128xf32, #tpu.memory_space<vmem>>, vector<32x64xf32>
    %cst_36 = arith.constant dense<0.000000e+00> : vector<16x64xf32>
    %104 = tpu.matmul %102, %103, %cst_36 {dimension_numbers = #tpu.dot_dimension_numbers<[1], [0], [0], [1], [0, 0, 1, 1], [], []>} : vector<16x32xf32>, vector<32x64xf32>, vector<16x64xf32> -> vector<16x64xf32>
    %c208 = arith.constant 208 : index
    %c0_37 = arith.constant 0 : index
    %105 = vector.load %arg1[%c208, %c0_37] : memref<568x128xf32, #tpu.memory_space<vmem>>, vector<1x64xf32>
    %106 = vector.broadcast %105 : vector<1x64xf32> to vector<16x64xf32>
    %107 = arith.addf %104, %106 : vector<16x64xf32>
    %cst_38 = arith.constant 5.000000e-01 : f32
    %108 = vector.broadcast %cst_38 : f32 to vector<16x64xf32>
    %109 = arith.mulf %108, %107 : vector<16x64xf32>
    %cst_39 = arith.constant 4.471500e-02 : f32
    %110 = vector.broadcast %cst_39 : f32 to vector<16x64xf32>
    %111 = arith.mulf %110, %107 : vector<16x64xf32>
    %112 = arith.mulf %111, %107 : vector<16x64xf32>
    %113 = arith.mulf %112, %107 : vector<16x64xf32>
    %114 = arith.addf %107, %113 : vector<16x64xf32>
    %cst_40 = arith.constant 0.797884583 : f32
    %115 = vector.broadcast %cst_40 : f32 to vector<16x64xf32>
    %116 = arith.mulf %115, %114 : vector<16x64xf32>
    %117 = math.tanh %116 : vector<16x64xf32>
    %cst_41 = arith.constant 1.000000e+00 : f32
    %118 = vector.broadcast %cst_41 : f32 to vector<16x64xf32>
    %119 = arith.addf %118, %117 : vector<16x64xf32>
    %120 = arith.mulf %109, %119 : vector<16x64xf32>
    %c216 = arith.constant 216 : index
    %c0_42 = arith.constant 0 : index
    %121 = vector.load %arg1[%c216, %c0_42] : memref<568x128xf32, #tpu.memory_space<vmem>>, vector<64x32xf32>
    %cst_43 = arith.constant dense<0.000000e+00> : vector<16x32xf32>
    %122 = tpu.matmul %120, %121, %cst_43 {dimension_numbers = #tpu.dot_dimension_numbers<[1], [0], [0], [1], [0, 0, 1, 1], [], []>} : vector<16x64xf32>, vector<64x32xf32>, vector<16x32xf32> -> vector<16x32xf32>
    %c280 = arith.constant 280 : index
    %c0_44 = arith.constant 0 : index
    %123 = vector.load %arg1[%c280, %c0_44] : memref<568x128xf32, #tpu.memory_space<vmem>>, vector<1x32xf32>
    %124 = vector.broadcast %123 : vector<1x32xf32> to vector<16x32xf32>
    %125 = arith.addf %122, %124 : vector<16x32xf32>
    %126 = arith.addf %125, %102 : vector<16x32xf32>
    %c288 = arith.constant 288 : index
    %c0_45 = arith.constant 0 : index
    %127 = vector.load %arg1[%c288, %c0_45] : memref<568x128xf32, #tpu.memory_space<vmem>>, vector<1x32xf32>
    %c296 = arith.constant 296 : index
    %c0_46 = arith.constant 0 : index
    %128 = vector.load %arg1[%c296, %c0_46] : memref<568x128xf32, #tpu.memory_space<vmem>>, vector<1x32xf32>
    %cst_47 = arith.constant dense<0.000000e+00> : vector<16xf32>
    %129 = vector.multi_reduction <add>, %126, %cst_47 [1] : vector<16x32xf32> to vector<16xf32>
    %130 = vector.shape_cast %129 : vector<16xf32> to vector<16x1xf32>
    %cst_48 = arith.constant 3.200000e+01 : f32
    %131 = vector.broadcast %cst_48 : f32 to vector<16x1xf32>
    %132 = arith.divf %130, %131 : vector<16x1xf32>
    %133 = vector.broadcast %132 : vector<16x1xf32> to vector<16x32xf32>
    %134 = arith.subf %126, %133 : vector<16x32xf32>
    %135 = arith.mulf %134, %134 : vector<16x32xf32>
    %cst_49 = arith.constant dense<0.000000e+00> : vector<16xf32>
    %136 = vector.multi_reduction <add>, %135, %cst_49 [1] : vector<16x32xf32> to vector<16xf32>
    %137 = vector.shape_cast %136 : vector<16xf32> to vector<16x1xf32>
    %cst_50 = arith.constant 3.200000e+01 : f32
    %138 = vector.broadcast %cst_50 : f32 to vector<16x1xf32>
    %139 = arith.divf %137, %138 : vector<16x1xf32>
    %cst_51 = arith.constant 9.99999996E-13 : f32
    %140 = vector.broadcast %cst_51 : f32 to vector<16x1xf32>
    %141 = arith.addf %139, %140 : vector<16x1xf32>
    %142 = math.rsqrt %141 : vector<16x1xf32>
    %143 = vector.broadcast %142 : vector<16x1xf32> to vector<16x32xf32>
    %144 = arith.mulf %134, %143 : vector<16x32xf32>
    %145 = vector.broadcast %127 : vector<1x32xf32> to vector<16x32xf32>
    %146 = arith.mulf %144, %145 : vector<16x32xf32>
    %147 = vector.broadcast %128 : vector<1x32xf32> to vector<16x32xf32>
    %148 = arith.addf %146, %147 : vector<16x32xf32>
    %c304 = arith.constant 304 : index
    %c0_52 = arith.constant 0 : index
    %149 = vector.load %arg1[%c304, %c0_52] : memref<568x128xf32, #tpu.memory_space<vmem>>, vector<32x96xf32>
    %cst_53 = arith.constant dense<0.000000e+00> : vector<16x96xf32>
    %150 = tpu.matmul %148, %149, %cst_53 {dimension_numbers = #tpu.dot_dimension_numbers<[1], [0], [0], [1], [0, 0, 1, 1], [], []>} : vector<16x32xf32>, vector<32x96xf32>, vector<16x96xf32> -> vector<16x96xf32>
    %c336 = arith.constant 336 : index
    %c0_54 = arith.constant 0 : index
    %151 = vector.load %arg1[%c336, %c0_54] : memref<568x128xf32, #tpu.memory_space<vmem>>, vector<1x96xf32>
    %152 = vector.broadcast %151 : vector<1x96xf32> to vector<16x96xf32>
    %153 = arith.addf %150, %152 : vector<16x96xf32>
    %154 = vector.extract_strided_slice %153 {offsets = [0, 0], sizes = [16, 16], strides = [1, 1]} : vector<16x96xf32> to vector<16x16xf32>
    %155 = vector.extract_strided_slice %153 {offsets = [0, 32], sizes = [16, 16], strides = [1, 1]} : vector<16x96xf32> to vector<16x16xf32>
    %156 = vector.extract_strided_slice %153 {offsets = [0, 64], sizes = [16, 16], strides = [1, 1]} : vector<16x96xf32> to vector<16x16xf32>
    %cst_55 = arith.constant dense<0.000000e+00> : vector<16x16xf32>
    %157 = tpu.matmul %154, %155, %cst_55 {dimension_numbers = #tpu.dot_dimension_numbers<[1], [1], [0], [0], [0, 0, 1, 0], [], []>} : vector<16x16xf32>, vector<16x16xf32>, vector<16x16xf32> -> vector<16x16xf32>
    %cst_56 = arith.constant 2.500000e-01 : f32
    %158 = vector.broadcast %cst_56 : f32 to vector<16x16xf32>
    %159 = arith.mulf %157, %158 : vector<16x16xf32>
    %160 = arith.addf %159, %32 : vector<16x16xf32>
    %cst_57 = arith.constant dense<0xFF800000> : vector<16xf32>
    %161 = vector.multi_reduction <maximumf>, %160, %cst_57 [1] : vector<16x16xf32> to vector<16xf32>
    %162 = vector.shape_cast %161 : vector<16xf32> to vector<16x1xf32>
    %163 = vector.broadcast %162 : vector<16x1xf32> to vector<16x16xf32>
    %164 = arith.subf %160, %163 : vector<16x16xf32>
    %165 = math.exp %164 : vector<16x16xf32>
    %cst_58 = arith.constant dense<0.000000e+00> : vector<16xf32>
    %166 = vector.multi_reduction <add>, %165, %cst_58 [1] : vector<16x16xf32> to vector<16xf32>
    %167 = vector.shape_cast %166 : vector<16xf32> to vector<16x1xf32>
    %168 = tpu.reciprocal %167 {approx = true} : vector<16x1xf32> -> vector<16x1xf32>
    %169 = vector.broadcast %168 : vector<16x1xf32> to vector<16x16xf32>
    %170 = arith.mulf %165, %169 : vector<16x16xf32>
    %cst_59 = arith.constant dense<0.000000e+00> : vector<16x16xf32>
    %171 = tpu.matmul %170, %156, %cst_59 {dimension_numbers = #tpu.dot_dimension_numbers<[1], [0], [0], [1], [0, 0, 1, 1], [], []>} : vector<16x16xf32>, vector<16x16xf32>, vector<16x16xf32> -> vector<16x16xf32>
    %172 = vector.extract_strided_slice %153 {offsets = [0, 16], sizes = [16, 16], strides = [1, 1]} : vector<16x96xf32> to vector<16x16xf32>
    %173 = vector.extract_strided_slice %153 {offsets = [0, 48], sizes = [16, 16], strides = [1, 1]} : vector<16x96xf32> to vector<16x16xf32>
    %174 = vector.extract_strided_slice %153 {offsets = [0, 80], sizes = [16, 16], strides = [1, 1]} : vector<16x96xf32> to vector<16x16xf32>
    %cst_60 = arith.constant dense<0.000000e+00> : vector<16x16xf32>
    %175 = tpu.matmul %172, %173, %cst_60 {dimension_numbers = #tpu.dot_dimension_numbers<[1], [1], [0], [0], [0, 0, 1, 0], [], []>} : vector<16x16xf32>, vector<16x16xf32>, vector<16x16xf32> -> vector<16x16xf32>
    %cst_61 = arith.constant 2.500000e-01 : f32
    %176 = vector.broadcast %cst_61 : f32 to vector<16x16xf32>
    %177 = arith.mulf %175, %176 : vector<16x16xf32>
    %178 = arith.addf %177, %32 : vector<16x16xf32>
    %cst_62 = arith.constant dense<0xFF800000> : vector<16xf32>
    %179 = vector.multi_reduction <maximumf>, %178, %cst_62 [1] : vector<16x16xf32> to vector<16xf32>
    %180 = vector.shape_cast %179 : vector<16xf32> to vector<16x1xf32>
    %181 = vector.broadcast %180 : vector<16x1xf32> to vector<16x16xf32>
    %182 = arith.subf %178, %181 : vector<16x16xf32>
    %183 = math.exp %182 : vector<16x16xf32>
    %cst_63 = arith.constant dense<0.000000e+00> : vector<16xf32>
    %184 = vector.multi_reduction <add>, %183, %cst_63 [1] : vector<16x16xf32> to vector<16xf32>
    %185 = vector.shape_cast %184 : vector<16xf32> to vector<16x1xf32>
    %186 = tpu.reciprocal %185 {approx = true} : vector<16x1xf32> -> vector<16x1xf32>
    %187 = vector.broadcast %186 : vector<16x1xf32> to vector<16x16xf32>
    %188 = arith.mulf %183, %187 : vector<16x16xf32>
    %cst_64 = arith.constant dense<0.000000e+00> : vector<16x16xf32>
    %189 = tpu.matmul %188, %174, %cst_64 {dimension_numbers = #tpu.dot_dimension_numbers<[1], [0], [0], [1], [0, 0, 1, 1], [], []>} : vector<16x16xf32>, vector<16x16xf32>, vector<16x16xf32> -> vector<16x16xf32>
    %190 = tpu.concatenate %171, %189 in 1 : vector<16x16xf32>, vector<16x16xf32> -> vector<16x32xf32>
    %c344 = arith.constant 344 : index
    %c0_65 = arith.constant 0 : index
    %191 = vector.load %arg1[%c344, %c0_65] : memref<568x128xf32, #tpu.memory_space<vmem>>, vector<32x32xf32>
    %cst_66 = arith.constant dense<0.000000e+00> : vector<16x32xf32>
    %192 = tpu.matmul %190, %191, %cst_66 {dimension_numbers = #tpu.dot_dimension_numbers<[1], [0], [0], [1], [0, 0, 1, 1], [], []>} : vector<16x32xf32>, vector<32x32xf32>, vector<16x32xf32> -> vector<16x32xf32>
    %c376 = arith.constant 376 : index
    %c0_67 = arith.constant 0 : index
    %193 = vector.load %arg1[%c376, %c0_67] : memref<568x128xf32, #tpu.memory_space<vmem>>, vector<1x32xf32>
    %194 = vector.broadcast %193 : vector<1x32xf32> to vector<16x32xf32>
    %195 = arith.addf %192, %194 : vector<16x32xf32>
    %196 = arith.addf %195, %148 : vector<16x32xf32>
    %c384 = arith.constant 384 : index
    %c0_68 = arith.constant 0 : index
    %197 = vector.load %arg1[%c384, %c0_68] : memref<568x128xf32, #tpu.memory_space<vmem>>, vector<1x32xf32>
    %c392 = arith.constant 392 : index
    %c0_69 = arith.constant 0 : index
    %198 = vector.load %arg1[%c392, %c0_69] : memref<568x128xf32, #tpu.memory_space<vmem>>, vector<1x32xf32>
    %cst_70 = arith.constant dense<0.000000e+00> : vector<16xf32>
    %199 = vector.multi_reduction <add>, %196, %cst_70 [1] : vector<16x32xf32> to vector<16xf32>
    %200 = vector.shape_cast %199 : vector<16xf32> to vector<16x1xf32>
    %cst_71 = arith.constant 3.200000e+01 : f32
    %201 = vector.broadcast %cst_71 : f32 to vector<16x1xf32>
    %202 = arith.divf %200, %201 : vector<16x1xf32>
    %203 = vector.broadcast %202 : vector<16x1xf32> to vector<16x32xf32>
    %204 = arith.subf %196, %203 : vector<16x32xf32>
    %205 = arith.mulf %204, %204 : vector<16x32xf32>
    %cst_72 = arith.constant dense<0.000000e+00> : vector<16xf32>
    %206 = vector.multi_reduction <add>, %205, %cst_72 [1] : vector<16x32xf32> to vector<16xf32>
    %207 = vector.shape_cast %206 : vector<16xf32> to vector<16x1xf32>
    %cst_73 = arith.constant 3.200000e+01 : f32
    %208 = vector.broadcast %cst_73 : f32 to vector<16x1xf32>
    %209 = arith.divf %207, %208 : vector<16x1xf32>
    %cst_74 = arith.constant 9.99999996E-13 : f32
    %210 = vector.broadcast %cst_74 : f32 to vector<16x1xf32>
    %211 = arith.addf %209, %210 : vector<16x1xf32>
    %212 = math.rsqrt %211 : vector<16x1xf32>
    %213 = vector.broadcast %212 : vector<16x1xf32> to vector<16x32xf32>
    %214 = arith.mulf %204, %213 : vector<16x32xf32>
    %215 = vector.broadcast %197 : vector<1x32xf32> to vector<16x32xf32>
    %216 = arith.mulf %214, %215 : vector<16x32xf32>
    %217 = vector.broadcast %198 : vector<1x32xf32> to vector<16x32xf32>
    %218 = arith.addf %216, %217 : vector<16x32xf32>
    %c400 = arith.constant 400 : index
    %c0_75 = arith.constant 0 : index
    %219 = vector.load %arg1[%c400, %c0_75] : memref<568x128xf32, #tpu.memory_space<vmem>>, vector<32x64xf32>
    %cst_76 = arith.constant dense<0.000000e+00> : vector<16x64xf32>
    %220 = tpu.matmul %218, %219, %cst_76 {dimension_numbers = #tpu.dot_dimension_numbers<[1], [0], [0], [1], [0, 0, 1, 1], [], []>} : vector<16x32xf32>, vector<32x64xf32>, vector<16x64xf32> -> vector<16x64xf32>
    %c432 = arith.constant 432 : index
    %c0_77 = arith.constant 0 : index
    %221 = vector.load %arg1[%c432, %c0_77] : memref<568x128xf32, #tpu.memory_space<vmem>>, vector<1x64xf32>
    %222 = vector.broadcast %221 : vector<1x64xf32> to vector<16x64xf32>
    %223 = arith.addf %220, %222 : vector<16x64xf32>
    %cst_78 = arith.constant 5.000000e-01 : f32
    %224 = vector.broadcast %cst_78 : f32 to vector<16x64xf32>
    %225 = arith.mulf %224, %223 : vector<16x64xf32>
    %cst_79 = arith.constant 4.471500e-02 : f32
    %226 = vector.broadcast %cst_79 : f32 to vector<16x64xf32>
    %227 = arith.mulf %226, %223 : vector<16x64xf32>
    %228 = arith.mulf %227, %223 : vector<16x64xf32>
    %229 = arith.mulf %228, %223 : vector<16x64xf32>
    %230 = arith.addf %223, %229 : vector<16x64xf32>
    %cst_80 = arith.constant 0.797884583 : f32
    %231 = vector.broadcast %cst_80 : f32 to vector<16x64xf32>
    %232 = arith.mulf %231, %230 : vector<16x64xf32>
    %233 = math.tanh %232 : vector<16x64xf32>
    %cst_81 = arith.constant 1.000000e+00 : f32
    %234 = vector.broadcast %cst_81 : f32 to vector<16x64xf32>
    %235 = arith.addf %234, %233 : vector<16x64xf32>
    %236 = arith.mulf %225, %235 : vector<16x64xf32>
    %c440 = arith.constant 440 : index
    %c0_82 = arith.constant 0 : index
    %237 = vector.load %arg1[%c440, %c0_82] : memref<568x128xf32, #tpu.memory_space<vmem>>, vector<64x32xf32>
    %cst_83 = arith.constant dense<0.000000e+00> : vector<16x32xf32>
    %238 = tpu.matmul %236, %237, %cst_83 {dimension_numbers = #tpu.dot_dimension_numbers<[1], [0], [0], [1], [0, 0, 1, 1], [], []>} : vector<16x64xf32>, vector<64x32xf32>, vector<16x32xf32> -> vector<16x32xf32>
    %c504 = arith.constant 504 : index
    %c0_84 = arith.constant 0 : index
    %239 = vector.load %arg1[%c504, %c0_84] : memref<568x128xf32, #tpu.memory_space<vmem>>, vector<1x32xf32>
    %240 = vector.broadcast %239 : vector<1x32xf32> to vector<16x32xf32>
    %241 = arith.addf %238, %240 : vector<16x32xf32>
    %242 = arith.addf %241, %218 : vector<16x32xf32>
    %c512 = arith.constant 512 : index
    %c0_85 = arith.constant 0 : index
    %243 = vector.load %arg1[%c512, %c0_85] : memref<568x128xf32, #tpu.memory_space<vmem>>, vector<1x32xf32>
    %c520 = arith.constant 520 : index
    %c0_86 = arith.constant 0 : index
    %244 = vector.load %arg1[%c520, %c0_86] : memref<568x128xf32, #tpu.memory_space<vmem>>, vector<1x32xf32>
    %cst_87 = arith.constant dense<0.000000e+00> : vector<16xf32>
    %245 = vector.multi_reduction <add>, %242, %cst_87 [1] : vector<16x32xf32> to vector<16xf32>
    %246 = vector.shape_cast %245 : vector<16xf32> to vector<16x1xf32>
    %cst_88 = arith.constant 3.200000e+01 : f32
    %247 = vector.broadcast %cst_88 : f32 to vector<16x1xf32>
    %248 = arith.divf %246, %247 : vector<16x1xf32>
    %249 = vector.broadcast %248 : vector<16x1xf32> to vector<16x32xf32>
    %250 = arith.subf %242, %249 : vector<16x32xf32>
    %251 = arith.mulf %250, %250 : vector<16x32xf32>
    %cst_89 = arith.constant dense<0.000000e+00> : vector<16xf32>
    %252 = vector.multi_reduction <add>, %251, %cst_89 [1] : vector<16x32xf32> to vector<16xf32>
    %253 = vector.shape_cast %252 : vector<16xf32> to vector<16x1xf32>
    %cst_90 = arith.constant 3.200000e+01 : f32
    %254 = vector.broadcast %cst_90 : f32 to vector<16x1xf32>
    %255 = arith.divf %253, %254 : vector<16x1xf32>
    %cst_91 = arith.constant 9.99999996E-13 : f32
    %256 = vector.broadcast %cst_91 : f32 to vector<16x1xf32>
    %257 = arith.addf %255, %256 : vector<16x1xf32>
    %258 = math.rsqrt %257 : vector<16x1xf32>
    %259 = vector.broadcast %258 : vector<16x1xf32> to vector<16x32xf32>
    %260 = arith.mulf %250, %259 : vector<16x32xf32>
    %261 = vector.broadcast %243 : vector<1x32xf32> to vector<16x32xf32>
    %262 = arith.mulf %260, %261 : vector<16x32xf32>
    %263 = vector.broadcast %244 : vector<1x32xf32> to vector<16x32xf32>
    %264 = arith.addf %262, %263 : vector<16x32xf32>
    %c528 = arith.constant 528 : index
    %c0_92 = arith.constant 0 : index
    %265 = vector.load %arg1[%c528, %c0_92] : memref<568x128xf32, #tpu.memory_space<vmem>>, vector<32x32xf32>
    %cst_93 = arith.constant dense<0.000000e+00> : vector<16x32xf32>
    %266 = tpu.matmul %264, %265, %cst_93 {dimension_numbers = #tpu.dot_dimension_numbers<[1], [0], [0], [1], [0, 0, 1, 1], [], []>} : vector<16x32xf32>, vector<32x32xf32>, vector<16x32xf32> -> vector<16x32xf32>
    %c560 = arith.constant 560 : index
    %c0_94 = arith.constant 0 : index
    %267 = vector.load %arg1[%c560, %c0_94] : memref<568x128xf32, #tpu.memory_space<vmem>>, vector<1x32xf32>
    %268 = vector.broadcast %267 : vector<1x32xf32> to vector<16x32xf32>
    %269 = arith.addf %266, %268 : vector<16x32xf32>
    %cst_95 = arith.constant dense<0xFF800000> : vector<16xf32>
    %270 = vector.multi_reduction <maximumf>, %269, %cst_95 [1] : vector<16x32xf32> to vector<16xf32>
    %271 = vector.shape_cast %270 : vector<16xf32> to vector<16x1xf32>
    %272 = vector.broadcast %271 : vector<16x1xf32> to vector<16x32xf32>
    %273 = arith.subf %269, %272 : vector<16x32xf32>
    %274 = math.exp %273 : vector<16x32xf32>
    %cst_96 = arith.constant dense<0.000000e+00> : vector<16xf32>
    %275 = vector.multi_reduction <add>, %274, %cst_96 [1] : vector<16x32xf32> to vector<16xf32>
    %276 = vector.shape_cast %275 : vector<16xf32> to vector<16x1xf32>
    %277 = vector.broadcast %276 : vector<16x1xf32> to vector<16x32xf32>
    %278 = arith.divf %274, %277 : vector<16x32xf32>
    %c0_97 = arith.constant 0 : index
    %c0_98 = arith.constant 0 : index
    %279 = vector.load %arg2[%c0_97, %c0_98] : memref<16x32xf32, #tpu.memory_space<vmem>>, vector<16x32xf32>
    tpu.vector_store %arg2[%c0_97, %c0_98], %278 {strides = array<i32>} : memref<16x32xf32, #tpu.memory_space<vmem>>, vector<16x32xf32>,
    return
  }
}

</mosaic_0001>

<bundles_post_ra>
// kernel: eq.8
= control target key start
LH: loop header
LB: loop body
LE: loop exit
PB: predicated region body
PF: predicated region fallthrough
CT: control target
= control target key end

     0   :  { %vm7_vm0 = vcmask 64512   ;;  %vm13_vm1 = vcmask 130112   ;;  %s39_s0 = inlined_call_operand.vmem [shape: s32[2,8], index: 0, kind: input, shape index: {}]   ;;  %s40_s1 = inlined_call_operand.vmem [shape: s32[16], index: 1, kind: output, shape index: {}]  }
   0x1   :  { %v4_v0 = vld [vmem:[%s39_s0] sm:$0x3]  ;;  %s22_s0 = smov 8  }
   0x2   :  { %5 = vst [vmem:[#allocation1] sm:$0x3] %v4_v0 }
   0x9   :  { %v10_v1 = vld [vmem:[#allocation1 + $0x1] sm:$0x1]   ;;  %v6_v2 = vld [vmem:[#allocation1] sm:$0x1]  }
   0xa   :  { %11 = vrot.lane.b32.xlu0 %v10_v1, %s22_s0  ;;  %8 = vst.msk [vmem:[#allocation0] sm:$0x1] %vm7_vm0, %v6_v2  }
  0x7c   :  { %v12_v3 = vpop.permute.xlu0 %11  }
  0x7d   :  { %14 = vst.msk [vmem:[#allocation0] sm:$0x1] %vm13_vm1, %v12_v3  }
  0x84   :  { %v18_v4 = vld [vmem:[#allocation0] sm:$0x1] }
  0x85   :  { %20 = vst [vmem:[%s40_s1] sm:$0x1] %v18_v4 }

// kernel: _lambda_.1
= control target key start
LH: loop header
LB: loop body
LE: loop exit
PB: predicated region body
PF: predicated region fallthrough
CT: control target
= control target key end

     0   :  { %v2682_v2 = vmov 0   ;;  %s3102_s0 = inlined_call_operand.vmem [shape: s32[16,2], index: 0, kind: input, shape index: {}]   ;;  %s3103_s1 = inlined_call_operand.vmem [shape: f32[568,128], index: 1, kind: input, shape index: {}]   ;;  %s3104_s2 = inlined_call_operand.hbm [shape: f32[16,32], index: 2, kind: output, shape index: {}]  }
   0x1   :  { %v12_v0 = vld [vmem:[%s3102_s0] sm:$0xff]  ;;  %2549 = vset.pattern.permute.xlu0 %v2682_v2  ;;  %v29_v3 = vld [vmem:[%s3103_s1 + $0x8] sm:$0xff]  ;;  %v30_v4 = vld [vmem:[%s3103_s1 + $0x10] sm:$0xff] }
   0x2   :  { %v28_v1 = vld [vmem:[%s3103_s1] sm:$0xff]  ;;  %v31_v5 = vld [vmem:[%s3103_s1 + $0x18] sm:$0xff]  ;;  %17 = vperm.xlu0 %2549, %v12_v0  }
   0x3   :  { %v2402_v6 = vpack.c.bf16 %v29_v3, %v28_v1  ;;  %v2406_v7 = vpack.c.bf16 %v31_v5, %v30_v4 }
   0x4   :  { %7 = vsyncpa [#allocation3], 0  ;;  %v13_v8 = vld [vmem:[%s3102_s0 + $0x8] sm:$0xff]  ;;  %v14_v9 = vlaneseq  ;;  %vm34_vm0 = vcmask 261120   ;;  %v2683_v12 = vmov 0.0   ;;  %v32_v16 = vld [vmem:[%s3103_s1 + $0x20] sm:$0xff] }
   0x5   :  { %2403 = vmatprep.subr.bf16.mxu0 %v2402_v6  ;;  %v33_v18 = vld [vmem:[%s3103_s1 + $0x28] sm:$0xff]  ;;  %v159_v34 = vld [vmem:[%s3103_s1 + $0x50] sm:$0xff]  ;;  %v160_v35 = vld [vmem:[%s3103_s1 + $0x58] sm:$0xff]  ;;  %vm255_vm3 = vcmask 130048   ;;  %s2684_s10 = smov 96   ;;  %s2685_s15 = smov 80  }
   0x6   :  { %2405 = vmatpush3.bf16.msra.mxu0 %v2402_v6  ;;  %20 = vperm.xlu0 %2549, %v13_v8   ;;  %v15_v10 = vand.u32 127, %v14_v9  ;;  %v161_v36 = vld [vmem:[%s3103_s1 + $0x60] sm:$0xff]  ;;  %v2410_v37 = vpack.c.bf16 %v160_v35, %v159_v34  ;;  %v162_v38 = vld [vmem:[%s3103_s1 + $0x68] sm:$0xff]  ;;  %v2061_v56 = vld [vmem:[%s3103_s1 + $0x70] ss:$0 sm:$0xff]  ;;  %s2686_s16 = smov 64  }
   0x7   :  { %2407 = vmatprep.subr.bf16.mxu0 %v2406_v7  ;;  %v2414_v39 = vpack.c.bf16 %v162_v38, %v161_v36  ;;  %v2059_v47 = vld [vmem:[%s3103_s1 + $0x40] ss:$0 sm:$0xff]  ;;  %v2060_v49 = vld [vmem:[%s3103_s1 + $0x48] ss:$0 sm:$0xff]  ;;  %vm2774_vm4 = vmpackc.low %vm255_vm3, %vm255_vm3  ;;  %s2687_s17 = smov 112   ;;  %s2688_s18 = smov 48  }
   0x8   :  { %2411 = vmatprep.subr.bf16.mxu1 %v2410_v37  ;;  %v2786_v4 = vld [vmem:[%s3103_s1 + $0x38] sm:$0xff]  ;;  %s2689_s26 = smov 16   ;;  %vm919_vm5 = vcmask 523264  }
   0x9   :  { %2413 = vmatpush3.bf16.msra.mxu1 %v2410_v37 }
   0xa   :  { %2409 = vmatpush3.bf16.msra.mxu0 %v2406_v7  ;;  %2415 = vmatprep.subr.bf16.mxu1 %v2414_v39  ;;  %v2791_v7 = vld [vmem:[%s3103_s1 + $0x30] sm:$0xff] }
   0xd   :  { %2417 = vmatpush3.bf16.msra.mxu1 %v2414_v39 }
  0x81   :  { %v18_v11 = vpop.permute.xlu0 %17 }
  0x82   :  { %vm22_vm1 = vcmp.eq.s32.totalorder %v15_v10, %v18_v11 }
  0x83   :  { %v2055_v13 = vsel %vm22_vm1, 1.0, %v2683_v12 }
  0x84   :  { %2228 = vmatprep.mubr.msk.f32.mxu0 %vm34_vm0, %v2055_v13 }
  0x85   :  { %v21_v14 = vpop.permute.xlu0 %20 }
  0x86   :  { %vm23_vm2 = vcmp.eq.s32.totalorder %v15_v10, %v21_v14 }
  0x87   :  { %v2056_v15 = vsel %vm23_vm2, 1.0, %v2683_v12 }
  0x88   :  { %2229 = vmatmul.mubr.msk.f32.vlgmr.msra.gmra.mrb[0].mxu0 %vm34_vm0, %v2056_v15 }
 0x15b   :  { %v2230_v17 = vpop.f32.mrb[0].mxu0 }
 0x15c   :  { %v107_v19 = vpop.f32.mrb[1].mxu0  ;;  %v113_v21 = vadd.f32 %v2230_v17, %v33_v18 }
 0x15d   :  { %v108_v20 = vadd.f32 %v107_v19, %v32_v16 }
 0x15e   :  { %v121_v23 = vsel %vm34_vm0, %v113_v21, 0.0 }
 0x15f   :  { %v118_v22 = vsel %vm34_vm0, %v108_v20, 0.0 }
 0x160   :  { %119 = vadd.xlane.f32.xlu1 %v118_v22 }
 0x164   :  { %122 = vadd.xlane.f32.xlu1 %v121_v23 }
 0x1ed   :  { %v120_v24 = vpop.xlane.xlu1 %119 }
 0x1ee   :  { %v125_v25 = vmul.f32 0.03125, %v120_v24 }
 0x1f0   :  { %v127_v26 = vsub.f32 %v108_v20, %v125_v25 }
 0x1f1   :  { %v123_v27 = vpop.xlane.xlu1 %122 }
 0x1f2   :  { %v126_v28 = vmul.f32 0.03125, %v123_v27  ;;  %v129_v29 = vmul.f32 %v127_v26, %v127_v26 }
 0x1f4   :  { %v128_v30 = vsub.f32 %v113_v21, %v126_v28  ;;  %v131_v31 = vsel %vm34_vm0, %v129_v29, 0.0 }
 0x1f5   :  { %132 = vadd.xlane.f32.xlu0 %v131_v31 }
 0x1f6   :  { %v130_v32 = vmul.f32 %v128_v30, %v128_v30 }
 0x1f8   :  { %v134_v33 = vsel %vm34_vm0, %v130_v32, 0.0 }
 0x1f9   :  { %135 = vadd.xlane.f32.xlu1 %v134_v33 }
 0x282   :  { %v133_v40 = vpop.xlane.xlu0 %132 }
 0x283   :  { %v137_v41 = vmul.f32 0.03125, %v133_v40 }
 0x285   :  { %v139_v42 = vadd.f32 1e-12, %v137_v41 }
 0x286   :  { %v136_v43 = vpop.xlane.xlu1 %135 }
 0x287   :  { %2590 = vrsqrt.f32 %v139_v42  ;;  %v138_v44 = vmul.f32 0.03125, %v136_v43 }
 0x289   :  { %v140_v45 = vadd.f32 1e-12, %v138_v44 }
 0x28b   :  { %2592 = vrsqrt.f32 %v140_v45 }
 0x291   :  { %v2591_v46 = vpop.eup %2590 }
 0x292   :  { %v143_v48 = vmul.f32 %v2591_v46, %v127_v26 }
 0x294   :  { %v149_v50 = vmul.f32 %v2059_v47, %v143_v48 }
 0x295   :  { %v2593_v51 = vpop.eup %2592 }
 0x296   :  { %v144_v52 = vmul.f32 %v2593_v51, %v128_v30  ;;  %v2756_v53 = vadd.f32 %v2060_v49, %v149_v50 }
 0x298   :  { %v150_v54 = vmul.f32 %v2059_v47, %v144_v52  ;;  %2239 = vmatprep.mubr.msk.f32.mxu1 %vm34_vm0, %v2756_v53 }
 0x29a   :  { %v2760_v55 = vadd.f32 %v2060_v49, %v150_v54 }
 0x29c   :  { %2240 = vmatmul.mubr.msk.f32.vlgmr.msra.gmra.mrb[0].mxu1 %vm34_vm0, %v2760_v55 }
 0x36f   :  { %v2241_v57 = vpop.f32.mrb[0].mxu1 }
 0x370   :  { %v246_v58 = vadd.f32 %v2241_v57, %v2061_v56  ;;  %v240_v59 = vpop.f32.mrb[1].mxu1 }
 0x371   :  { %v241_v60 = vadd.f32 %v2061_v56, %v240_v59 }
 0x373   :  { %2246 = vmatprep.mubr.msk.f32.mxu0 %vm255_vm3, %v241_v60  ;;  %v2768_v61 = vpack.i.bf16 %v246_v58, %v241_v60 }
 0x375   :  { %2551 = vrot.lane.b32.xlu1 %v2768_v61, %s2684_s10 }
 0x3e7   :  { %v2552_v62 = vpop.permute.xlu1 %2551 }
 0x3e8   :  { %v2554_v63 = vunpack.i.h.bf16 %v2552_v62  ;;  %v2553_v0 = vunpack.i.l.bf16 %v2552_v62 }
 0x3ea   :  { %v2418_v2 = vpack.c.bf16 %v2554_v63, %v2553_v0 }
 0x3ec   :  { %2420 = vmatprep.subr.msk.bf16.mxu0 %vm2774_vm4, %v2418_v2 }
 0x3ed   :  { %2423 = vmatpush3.bf16.xpose.msk.msra.mxu0 %vm2774_vm4, %v2418_v2 }
 0x3f4   :  { %2247 = vmatmul.mubr.msk.f32.vlgmr.msra.gmra.mrb[2].mxu0 %vm255_vm3, %v246_v58 }
 0x4c7   :  { %v2248_v3 = vpop.f32.mrb[2].mxu0 }
 0x4c8   :  { %v340_v5 = vmul.f32 0.25, %v2248_v3  ;;  %v330_v6 = vpop.f32.mrb[3].mxu0 }
 0x4c9   :  { %v339_v8 = vmul.f32 0.25, %v330_v6 }
 0x4ca   :  { %v342_v9 = vadd.f32 %v340_v5, %v2786_v4 }
 0x4cb   :  { %v341_v10 = vadd.f32 %v339_v8, %v2791_v7 }
 0x4cc   :  { %v346_v11 = vsel %vm255_vm3, %v342_v9, -inf }
 0x4cd   :  { %347 = vmax.xlane.f32.xlu0 %v346_v11  ;;  %v343_v12 = vsel %vm255_vm3, %v341_v10, -inf  ;;  %v667_v11 = vld [vmem:[%s3103_s1 + $0x80] sm:$0xff] }
 0x4ce   :  { %344 = vmax.xlane.f32.xlu1 %v343_v12  ;;  %v668_v12 = vld [vmem:[%s3103_s1 + $0x88] sm:$0xff] }
 0x4df   :  { %2561 = vrot.lane.b32.xlu1 %v2768_v61, %s2685_s15 }
 0x4e3   :  { %2556 = vrot.lane.b32.xlu0 %v2768_v61, %s2686_s16 }
 0x55a   :  { %v348_v13 = vpop.xlane.xlu0 %347 }
 0x55b   :  { %v350_v14 = vsub.f32 %v342_v9, %v348_v13  ;;  %v345_v15 = vpop.xlane.xlu1 %344 }
 0x55c   :  { %v349_v16 = vsub.f32 %v341_v10, %v345_v15  ;;  %v666_v10 = vld [vmem:[%s3103_s1 + $0x78] sm:$0xff] }
 0x55d   :  { %v353_v17 = vmul.f32 1.442695, %v350_v14  ;;  %v2438_v13 = vpack.c.bf16 %v667_v11, %v666_v10  ;;  %v669_v14 = vld [vmem:[%s3103_s1 + $0x90] sm:$0xff]  ;;  %v912_v11 = vld [vmem:[%s3103_s1 + $0x108] sm:$0xff] }
 0x55e   :  { %v351_v18 = vmul.f32 1.442695, %v349_v16  ;;  %v2557_v19 = vpop.permute.xlu0 %2556  ;;  %v2442_v15 = vpack.c.bf16 %v669_v14, %v668_v12  ;;  %v913_v12 = vld [vmem:[%s3103_s1 + $0x110] sm:$0xff] }
 0x55f   :  { %2594 = vpow2.f32 %v353_v17  ;;  %v2559_v20 = vunpack.i.h.bf16 %v2557_v19  ;;  %v2558_v21 = vunpack.i.l.bf16 %v2557_v19  ;;  %v2562_v22 = vpop.permute.xlu1 %2561  ;;  %2439 = vmatprep.subr.bf16.mxu0 %v2438_v13  ;;  %v2081_v14 = vld [vmem:[%s3103_s1 + $0xd0] ss:$0 sm:$0xff] }
 0x560   :  { %v2564_v23 = vunpack.i.h.bf16 %v2562_v22  ;;  %v2563_v24 = vunpack.i.l.bf16 %v2562_v22  ;;  %2596 = vpow2.f32 %v351_v18  ;;  %2441 = vmatpush3.bf16.msra.mxu0 %v2438_v13  ;;  %v2076_v22 = vld [vmem:[%s3103_s1 + $0x98] ss:$0 sm:$0xff]  ;;  %v2466_v13 = vpack.c.bf16 %v913_v12, %v912_v11  ;;  %v2088_v12 = vld [vmem:[%s3103_s1 + $0x128] ss:$0 sm:$0xff] }
 0x561   :  { %v2424_v25 = vpack.c.bf16 %v2559_v20, %v2558_v21  ;;  %2443 = vmatprep.subr.bf16.mxu0 %v2442_v15 }
 0x562   :  { %v2428_v26 = vpack.c.bf16 %v2564_v23, %v2563_v24 }
 0x563   :  { %2425 = vmatprep.subr.bf16.mxu1 %v2424_v25 }
 0x564   :  { %2427 = vmatpush3.bf16.msra.mxu1 %v2424_v25  ;;  %2445 = vmatpush3.bf16.msra.mxu0 %v2442_v15 }
 0x565   :  { %2430 = vmatprep.subr.msk.bf16.mxu1 %vm2774_vm4, %v2428_v26 }
 0x569   :  { %v2595_v27 = vpop.eup %2594 }
 0x56a   :  { %v358_v28 = vsel %vm255_vm3, %v2595_v27, 0.0  ;;  %v2597_v29 = vpop.eup %2596 }
 0x56b   :  { %359 = vadd.xlane.f32.xlu0 %v358_v28  ;;  %v355_v30 = vsel %vm255_vm3, %v2597_v29, 0.0 }
 0x56f   :  { %356 = vadd.xlane.f32.xlu0 %v355_v30 }
 0x585   :  { %452 = vrot.lane.b32.xlu0 %v241_v60, %s2687_s17 }
 0x589   :  { %454 = vrot.lane.b32.xlu0 %v246_v58, %s2687_s17 }
 0x5f8   :  { %v360_v31 = vpop.xlane.xlu0 %359 }
 0x5f9   :  { %2598 = vrcp.f32 %v360_v31 }
 0x5fc   :  { %v357_v32 = vpop.xlane.xlu0 %356 }
 0x5fd   :  { %2600 = vrcp.f32 %v357_v32 }
 0x600   :  { %v453_v37 = vpop.permute.xlu0 %452 }
 0x603   :  { %v2599_v33 = vpop.eup %2598 }
 0x604   :  { %v364_v36 = vmul.f32 %v2599_v33, %v2595_v27  ;;  %v455_v38 = vpop.permute.xlu0 %454 }
 0x607   :  { %v2601_v34 = vpop.eup %2600 }
 0x608   :  { %v363_v35 = vmul.f32 %v2601_v34, %v2597_v29 }
 0x60a   :  { %2253 = vmatprep.mubr.msk.f32.mxu1 %vm255_vm3, %v363_v35 }
 0x60b   :  { %2254 = vmatmul.mubr.msk.f32.vlgmr.msra.gmra.mrb[2].mxu1 %vm255_vm3, %v364_v36 }
 0x60c   :  { %2433 = vmatpush3.bf16.xpose.msk.msra.mxu1 %vm2774_vm4, %v2428_v26  ;;  %2260 = vmatprep.mubr.msk.f32.mxu1 %vm255_vm3, %v453_v37 }
 0x613   :  { %2261 = vmatmul.mubr.msk.f32.vlgmr.msra.gmra.mrb[4].mxu1 %vm255_vm3, %v455_v38 }
 0x6de   :  { %v2813_v39 = vpop.f32.mrb[2].mxu1 }
 0x6df   :  { %v443_v40 = vpop.f32.mrb[3].mxu1 }
 0x6e6   :  { %v2262_v41 = vpop.f32.mrb[4].mxu1 }
 0x6e7   :  { %v544_v42 = vmul.f32 0.25, %v2262_v41  ;;  %v534_v43 = vpop.f32.mrb[5].mxu1 }
 0x6e8   :  { %v543_v44 = vmul.f32 0.25, %v534_v43  ;;  %v801_v43 = vld [vmem:[%s3103_s1 + $0xc8] sm:$0xff] }
 0x6e9   :  { %v546_v45 = vadd.f32 %v544_v42, %v2786_v4  ;;  %v800_v42 = vld [vmem:[%s3103_s1 + $0xc0] sm:$0xff] }
 0x6ea   :  { %v545_v46 = vadd.f32 %v543_v44, %v2791_v7  ;;  %v2450_v44 = vpack.c.bf16 %v801_v43, %v800_v42 }
 0x6eb   :  { %v550_v47 = vsel %vm255_vm3, %v546_v45, -inf }
 0x6ec   :  { %551 = vmax.xlane.f32.xlu1 %v550_v47  ;;  %v547_v48 = vsel %vm255_vm3, %v545_v46, -inf }
 0x6ed   :  { %548 = vmax.xlane.f32.xlu0 %v547_v48 }
 0x6fd   :  { %2566 = vrot.lane.b32.xlu1 %v2768_v61, %s2688_s18 }
 0x779   :  { %v552_v49 = vpop.xlane.xlu1 %551 }
 0x77a   :  { %v554_v50 = vsub.f32 %v546_v45, %v552_v49  ;;  %v549_v51 = vpop.xlane.xlu0 %548 }
 0x77b   :  { %v553_v52 = vsub.f32 %v545_v46, %v549_v51 }
 0x77c   :  { %v557_v54 = vmul.f32 1.442695, %v554_v50 }
 0x77d   :  { %v555_v56 = vmul.f32 1.442695, %v553_v52  ;;  %v2567_v57 = vpop.permute.xlu1 %2566  ;;  %v2079_v52 = vld [vmem:[%s3103_s1 + $0xa0] ss:$0 sm:$0xff] }
 0x77e   :  { %v2569_v58 = vunpack.i.h.bf16 %v2567_v57  ;;  %v2568_v59 = vunpack.i.l.bf16 %v2567_v57 }
 0x77f   :  { %2602 = vpow2.f32 %v555_v56 }
 0x780   :  { %v2434_v60 = vpack.c.bf16 %v2569_v58, %v2568_v59  ;;  %2604 = vpow2.f32 %v557_v54  ;;  %v2080_v58 = vld [vmem:[%s3103_s1 + $0xa8] ss:$0 sm:$0xff] }
 0x782   :  { %2435 = vmatprep.subr.bf16.mxu1 %v2434_v60 }
 0x783   :  { %2437 = vmatpush3.bf16.msra.mxu1 %v2434_v60 }
 0x789   :  { %v2603_v62 = vpop.eup %2602 }
 0x78a   :  { %v559_v63 = vsel %vm255_vm3, %v2603_v62, 0.0  ;;  %v2605_v0 = vpop.eup %2604 }
 0x78b   :  { %560 = vadd.xlane.f32.xlu0 %v559_v63  ;;  %v562_v61 = vsel %vm255_vm3, %v2605_v0, 0.0 }
 0x78f   :  { %563 = vadd.xlane.f32.xlu0 %v562_v61  ;;  %v907_v61 = vld [vmem:[%s3103_s1 + $0xe0] sm:$0xff] }
 0x818   :  { %v561_v2 = vpop.xlane.xlu0 %560 }
 0x819   :  { %2606 = vrcp.f32 %v561_v2 }
 0x81c   :  { %v564_v3 = vpop.xlane.xlu0 %563 }
 0x81d   :  { %2608 = vrcp.f32 %v564_v3  ;;  %v908_v3 = vld [vmem:[%s3103_s1 + $0xe8] sm:$0xff] }
 0x823   :  { %v2607_v5 = vpop.eup %2606 }
 0x824   :  { %v567_v6 = vmul.f32 %v2607_v5, %v2603_v62  ;;  %v909_v5 = vld [vmem:[%s3103_s1 + $0xf0] sm:$0xff] }
 0x826   :  { %2267 = vmatprep.mubr.msk.f32.mxu1 %vm255_vm3, %v567_v6  ;;  %v910_v6 = vld [vmem:[%s3103_s1 + $0xf8] sm:$0xff] }
 0x827   :  { %v2609_v8 = vpop.eup %2608 }
 0x828   :  { %v568_v9 = vmul.f32 %v2609_v8, %v2605_v0  ;;  %v906_v0 = vld [vmem:[%s3103_s1 + $0xd8] sm:$0xff]  ;;  %v2458_v8 = vpack.c.bf16 %v909_v5, %v908_v3 }
 0x829   :  { %v2454_v2 = vpack.c.bf16 %v907_v61, %v906_v0 }
 0x82a   :  { %2268 = vmatmul.mubr.msk.f32.vlgmr.msra.gmra.mrb[6].mxu1 %vm255_vm3, %v568_v9  ;;  %v911_v9 = vld [vmem:[%s3103_s1 + $0x100] sm:$0xff] }
 0x82b   :  { %2455 = vmatprep.subr.bf16.mxu0 %v2454_v2  ;;  %v2462_v10 = vpack.c.bf16 %v911_v9, %v910_v6 }
 0x8fd   :  { %v2269_v16 = vpop.f32.mrb[6].mxu1 }
 0x8fe   :  { %660 = vrot.lane.b32.xlu1 %v2269_v16, %s2689_s26  ;;  %v647_v17 = vpop.f32.mrb[7].mxu1 }
 0x8ff   :  { %658 = vrot.lane.b32.xlu0 %v647_v17, %s2689_s26 }
 0x970   :  { %v661_v18 = vpop.permute.xlu1 %660 }
 0x971   :  { %v659_v19 = vpop.permute.xlu0 %658  ;;  %v665_v21 = vsel %vm255_vm3, %v2813_v39, %v661_v18 }
 0x972   :  { %v664_v20 = vsel %vm255_vm3, %v443_v40, %v659_v19  ;;  %v799_v40 = vld [vmem:[%s3103_s1 + $0xb8] sm:$0xff] }
 0x973   :  { %2278 = vmatprep.mubr.msk.f32.mxu0 %vm34_vm0, %v664_v20 }
 0x974   :  { %2279 = vmatmul.mubr.msk.f32.vlgmr.msra.gmra.mrb[4].mxu0 %vm34_vm0, %v665_v21 }
 0x975   :  { %2457 = vmatpush3.bf16.msra.mxu0 %v2454_v2 }
 0x976   :  { %2459 = vmatprep.subr.bf16.mxu0 %v2458_v8 }
 0x979   :  { %2461 = vmatpush3.bf16.msra.mxu0 %v2458_v8  ;;  %v2087_v8 = vld [vmem:[%s3103_s1 + $0x120] ss:$0 sm:$0xff] }
 0x97a   :  { %2463 = vmatprep.subr.bf16.mxu0 %v2462_v10 }
 0x97d   :  { %2465 = vmatpush3.bf16.msra.mxu0 %v2462_v10 }
 0x97e   :  { %2467 = vmatprep.subr.bf16.mxu0 %v2466_v13 }
 0x981   :  { %2469 = vmatpush3.bf16.msra.mxu0 %v2466_v13 }
 0xa47   :  { %v2280_v23 = vpop.f32.mrb[4].mxu0 }
 0xa48   :  { %v753_v24 = vadd.f32 %v2280_v23, %v2076_v22  ;;  %v747_v25 = vpop.f32.mrb[5].mxu0 }
 0xa49   :  { %v748_v26 = vadd.f32 %v2076_v22, %v747_v25 }
 0xa4a   :  { %v757_v27 = vadd.f32 %v753_v24, %v2760_v55 }
 0xa4b   :  { %v756_v28 = vadd.f32 %v748_v26, %v2756_v53  ;;  %v798_v53 = vld [vmem:[%s3103_s1 + $0xb0] sm:$0xff] }
 0xa4c   :  { %v763_v29 = vsel %vm34_vm0, %v757_v27, 0.0  ;;  %v2446_v41 = vpack.c.bf16 %v799_v40, %v798_v53 }
 0xa4d   :  { %764 = vadd.xlane.f32.xlu0 %v763_v29  ;;  %v760_v30 = vsel %vm34_vm0, %v756_v28, 0.0 }
 0xa4e   :  { %761 = vadd.xlane.f32.xlu1 %v760_v30  ;;  %2447 = vmatprep.subr.bf16.mxu1 %v2446_v41 }
 0xa4f   :  { %2449 = vmatpush3.bf16.msra.mxu1 %v2446_v41 }
 0xa50   :  { %2451 = vmatprep.subr.bf16.mxu1 %v2450_v44 }
 0xa53   :  { %2453 = vmatpush3.bf16.msra.mxu1 %v2450_v44 }
 0xada   :  { %v765_v31 = vpop.xlane.xlu0 %764 }
 0xadb   :  { %v767_v32 = vmul.f32 0.03125, %v765_v31  ;;  %v762_v33 = vpop.xlane.xlu1 %761 }
 0xadc   :  { %v766_v34 = vmul.f32 0.03125, %v762_v33 }
 0xadd   :  { %v769_v35 = vsub.f32 %v757_v27, %v767_v32 }
 0xade   :  { %v768_v36 = vsub.f32 %v756_v28, %v766_v34 }
 0xadf   :  { %v771_v37 = vmul.f32 %v769_v35, %v769_v35 }
 0xae0   :  { %v770_v38 = vmul.f32 %v768_v36, %v768_v36 }
 0xae1   :  { %v775_v39 = vsel %vm34_vm0, %v771_v37, 0.0  ;;  %v2084_v37 = vld [vmem:[%s3103_s1 + $0x118] ss:$0 sm:$0xff] }
 0xae2   :  { %776 = vadd.xlane.f32.xlu1 %v775_v39  ;;  %v772_v55 = vsel %vm34_vm0, %v770_v38, 0.0 }
 0xae3   :  { %773 = vadd.xlane.f32.xlu0 %v772_v55 }
 0xb6f   :  { %v777_v45 = vpop.xlane.xlu1 %776 }
 0xb70   :  { %v779_v46 = vmul.f32 0.03125, %v777_v45  ;;  %v774_v47 = vpop.xlane.xlu0 %773 }
 0xb71   :  { %v778_v48 = vmul.f32 0.03125, %v774_v47 }
 0xb72   :  { %v781_v49 = vadd.f32 1e-12, %v779_v46 }
 0xb73   :  { %v780_v50 = vadd.f32 1e-12, %v778_v48 }
 0xb74   :  { %2610 = vrsqrt.f32 %v781_v49 }
 0xb75   :  { %2612 = vrsqrt.f32 %v780_v50 }
 0xb7e   :  { %v2611_v51 = vpop.eup %2610 }
 0xb7f   :  { %v2613_v54 = vpop.eup %2612  ;;  %v785_v56 = vmul.f32 %v2611_v51, %v769_v35 }
 0xb80   :  { %v784_v57 = vmul.f32 %v2613_v54, %v768_v36 }
 0xb81   :  { %v791_v59 = vmul.f32 %v2079_v52, %v785_v56  ;;  %v1043_v56 = vld [vmem:[%s3103_s1 + $0x130] sm:$0xff] }
 0xb82   :  { %v790_v60 = vmul.f32 %v2079_v52, %v784_v57  ;;  %v1044_v57 = vld [vmem:[%s3103_s1 + $0x138] sm:$0xff] }
 0xb83   :  { %v797_v63 = vadd.f32 %v2080_v58, %v791_v59  ;;  %v1045_v59 = vld [vmem:[%s3103_s1 + $0x140] sm:$0xff] }
 0xb84   :  { %v796_v62 = vadd.f32 %v2080_v58, %v790_v60  ;;  %v2470_v58 = vpack.c.bf16 %v1044_v57, %v1043_v56  ;;  %v1046_v60 = vld [vmem:[%s3103_s1 + $0x148] sm:$0xff] }
 0xb86   :  { %2289 = vmatprep.mubr.msk.f32.mxu1 %vm34_vm0, %v796_v62  ;;  %2471 = vmatprep.subr.bf16.mxu1 %v2470_v58 }
 0xb87   :  { %2290 = vmatmul.mubr.msk.f32.vlgmr.msra.gmra.mrb[8].mxu1 %vm34_vm0, %v797_v63 }
 0xb88   :  { %2473 = vmatpush3.bf16.msra.mxu1 %v2470_v58 }
 0xc5a   :  { %v2291_v15 = vpop.f32.mrb[8].mxu1 }
 0xc5b   :  { %v885_v16 = vadd.f32 %v2291_v15, %v2081_v14  ;;  %v879_v17 = vpop.f32.mrb[9].mxu1 }
 0xc5c   :  { %v880_v18 = vadd.f32 %v2081_v14, %v879_v17  ;;  %v2089_v17 = vld [vmem:[%s3103_s1 + $0x150] ss:$0 sm:$0xff] }
 0xc5d   :  { %v891_v19 = vmul.f32 0.044715, %v885_v16  ;;  %v889_v34 = vmul.f32 0.5, %v885_v16 }
 0xc5e   :  { %v890_v20 = vmul.f32 0.044715, %v880_v18  ;;  %v888_v32 = vmul.f32 0.5, %v880_v18 }
 0xc5f   :  { %v893_v21 = vmul.f32 %v891_v19, %v885_v16 }
 0xc60   :  { %v892_v22 = vmul.f32 %v890_v20, %v880_v18 }
 0xc61   :  { %v895_v23 = vmul.f32 %v893_v21, %v885_v16 }
 0xc62   :  { %v894_v24 = vmul.f32 %v892_v22, %v880_v18 }
 0xc63   :  { %v897_v25 = vadd.f32 %v895_v23, %v885_v16 }
 0xc64   :  { %v896_v26 = vadd.f32 %v894_v24, %v880_v18 }
 0xc65   :  { %v899_v27 = vmul.f32 0.7978846, %v897_v25 }
 0xc66   :  { %v898_v28 = vmul.f32 0.7978846, %v896_v26 }
 0xc67   :  { %2614 = vtanh.f32 %v899_v27 }
 0xc68   :  { %2616 = vtanh.f32 %v898_v28 }
 0xc71   :  { %v2615_v29 = vpop.eup %2614 }
 0xc72   :  { %v2617_v30 = vpop.eup %2616  ;;  %v903_v31 = vadd.f32 1.0, %v2615_v29 }
 0xc73   :  { %v902_v33 = vadd.f32 1.0, %v2617_v30 }
 0xc74   :  { %v905_v36 = vmul.f32 %v903_v31, %v889_v34 }
 0xc75   :  { %v904_v35 = vmul.f32 %v902_v33, %v888_v32 }
 0xc77   :  { %2308 = vmatprep.mubr.msk.f32.mxu0 %vm919_vm5, %v904_v35 }
 0xc78   :  { %2309 = vmatmul.mubr.msk.f32.vlgmr.msra.gmra.mrb[6].mxu0 %vm919_vm5, %v905_v36 }
 0xd4b   :  { %v2310_v38 = vpop.f32.mrb[6].mxu0 }
 0xd4c   :  { %v998_v39 = vadd.f32 %v2310_v38, %v2084_v37  ;;  %v992_v55 = vpop.f32.mrb[7].mxu0 }
 0xd4d   :  { %v993_v53 = vadd.f32 %v2084_v37, %v992_v55 }
 0xd4e   :  { %v1002_v40 = vadd.f32 %v998_v39, %v797_v63 }
 0xd4f   :  { %v1001_v41 = vadd.f32 %v993_v53, %v796_v62  ;;  %v2474_v62 = vpack.c.bf16 %v1046_v60, %v1045_v59 }
 0xd50   :  { %v1008_v42 = vsel %vm34_vm0, %v1002_v40, 0.0 }
 0xd51   :  { %1009 = vadd.xlane.f32.xlu1 %v1008_v42  ;;  %v1005_v43 = vsel %vm34_vm0, %v1001_v41, 0.0  ;;  %2475 = vmatprep.subr.bf16.mxu1 %v2474_v62 }
 0xd52   :  { %1006 = vadd.xlane.f32.xlu0 %v1005_v43  ;;  %2477 = vmatpush3.bf16.msra.mxu1 %v2474_v62 }
 0xdde   :  { %v1010_v44 = vpop.xlane.xlu1 %1009 }
 0xddf   :  { %v1012_v45 = vmul.f32 0.03125, %v1010_v44  ;;  %v1007_v46 = vpop.xlane.xlu0 %1006 }
 0xde0   :  { %v1011_v47 = vmul.f32 0.03125, %v1007_v46 }
 0xde1   :  { %v1014_v48 = vsub.f32 %v1002_v40, %v1012_v45 }
 0xde2   :  { %v1013_v49 = vsub.f32 %v1001_v41, %v1011_v47 }
 0xde3   :  { %v1016_v50 = vmul.f32 %v1014_v48, %v1014_v48 }
 0xde4   :  { %v1015_v51 = vmul.f32 %v1013_v49, %v1013_v49 }
 0xde5   :  { %v1020_v52 = vsel %vm34_vm0, %v1016_v50, 0.0 }
 0xde6   :  { %1021 = vadd.xlane.f32.xlu1 %v1020_v52  ;;  %v1017_v54 = vsel %vm34_vm0, %v1015_v51, 0.0 }
 0xde7   :  { %1018 = vadd.xlane.f32.xlu0 %v1017_v54 }
 0xe73   :  { %v1022_v63 = vpop.xlane.xlu1 %1021 }
 0xe74   :  { %v1024_v0 = vmul.f32 0.03125, %v1022_v63  ;;  %v1019_v61 = vpop.xlane.xlu0 %1018 }
 0xe75   :  { %v1023_v2 = vmul.f32 0.03125, %v1019_v61 }
 0xe76   :  { %v1026_v3 = vadd.f32 1e-12, %v1024_v0 }
 0xe77   :  { %v1025_v5 = vadd.f32 1e-12, %v1023_v2 }
 0xe78   :  { %2618 = vrsqrt.f32 %v1026_v3 }
 0xe79   :  { %2620 = vrsqrt.f32 %v1025_v5 }
 0xe82   :  { %v2619_v6 = vpop.eup %2618 }
 0xe83   :  { %v2621_v9 = vpop.eup %2620  ;;  %v1030_v10 = vmul.f32 %v2619_v6, %v1014_v48 }
 0xe84   :  { %v1029_v11 = vmul.f32 %v2621_v9, %v1013_v49 }
 0xe85   :  { %v1036_v13 = vmul.f32 %v2087_v8, %v1030_v10 }
 0xe86   :  { %v1035_v14 = vmul.f32 %v2087_v8, %v1029_v11 }
 0xe87   :  { %v2929_v16 = vadd.f32 %v2088_v12, %v1036_v13 }
 0xe88   :  { %v2927_v15 = vadd.f32 %v2088_v12, %v1035_v14 }
 0xe8a   :  { %2319 = vmatprep.mubr.msk.f32.mxu1 %vm34_vm0, %v2927_v15 }
 0xe8b   :  { %2320 = vmatmul.mubr.msk.f32.vlgmr.msra.gmra.mrb[10].mxu1 %vm34_vm0, %v2929_v16 }
 0xf5e   :  { %v2321_v18 = vpop.f32.mrb[10].mxu1 }
 0xf5f   :  { %v1130_v19 = vadd.f32 %v2321_v18, %v2089_v17  ;;  %v1124_v20 = vpop.f32.mrb[11].mxu1 }
 0xf60   :  { %v1125_v21 = vadd.f32 %v2089_v17, %v1124_v20 }
 0xf62   :  { %2326 = vmatprep.mubr.msk.f32.mxu1 %vm255_vm3, %v1125_v21  ;;  %v2939_v22 = vpack.i.bf16 %v1130_v19, %v1125_v21 }
 0xf64   :  { %2576 = vrot.lane.b32.xlu1 %v2939_v22, %s2685_s15  ;;  %2571 = vrot.lane.b32.xlu0 %v2939_v22, %s2684_s10 }
 0xf68   :  { %1335 = vrot.lane.b32.xlu1 %v1125_v21, %s2687_s17  ;;  %1337 = vrot.lane.b32.xlu0 %v1130_v19, %s2687_s17 }
 0xfd6   :  { %v2577_v23 = vpop.permute.xlu1 %2576  ;;  %v2572_v24 = vpop.permute.xlu0 %2571 }
 0xfd7   :  { %v2579_v25 = vunpack.i.h.bf16 %v2577_v23  ;;  %v2578_v26 = vunpack.i.l.bf16 %v2577_v23  ;;  %v2574_v27 = vunpack.i.h.bf16 %v2572_v24  ;;  %v2573_v28 = vunpack.i.l.bf16 %v2572_v24 }
 0xfd9   :  { %v2478_v29 = vpack.c.bf16 %v2574_v27, %v2573_v28  ;;  %v2488_v30 = vpack.c.bf16 %v2579_v25, %v2578_v26  ;;  %v1549_v27 = vld [vmem:[%s3103_s1 + $0x158] sm:$0xff]  ;;  %v1550_v28 = vld [vmem:[%s3103_s1 + $0x160] sm:$0xff] }
 0xfda   :  { %v1336_v31 = vpop.permute.xlu1 %1335  ;;  %v1338_v32 = vpop.permute.xlu0 %1337 }
 0xfdb   :  { %2480 = vmatprep.subr.msk.bf16.mxu1 %vm2774_vm4, %v2478_v29 }
 0xfdc   :  { %2483 = vmatpush3.bf16.xpose.msk.msra.mxu1 %vm2774_vm4, %v2478_v29  ;;  %v1551_v29 = vld [vmem:[%s3103_s1 + $0x168] sm:$0xff] }
 0xfdd   :  { %2490 = vmatprep.subr.msk.bf16.mxu1 %vm2774_vm4, %v2488_v30 }
 0xfe3   :  { %2327 = vmatmul.mubr.msk.f32.vlgmr.msra.gmra.mrb[12].mxu1 %vm255_vm3, %v1130_v19 }
 0xfe4   :  { %2493 = vmatpush3.bf16.xpose.msk.msra.mxu1 %vm2774_vm4, %v2488_v30  ;;  %2340 = vmatprep.mubr.msk.f32.mxu1 %vm255_vm3, %v1336_v31  ;;  %v2498_v30 = vpack.c.bf16 %v1550_v28, %v1549_v27  ;;  %v1552_v31 = vld [vmem:[%s3103_s1 + $0x170] sm:$0xff]  ;;  %v1795_v27 = vld [vmem:[%s3103_s1 + $0x1e8] sm:$0xff] }
 0xfe5   :  { %v1796_v28 = vld [vmem:[%s3103_s1 + $0x1f0] sm:$0xff] }
 0xfeb   :  { %2341 = vmatmul.mubr.msk.f32.vlgmr.msra.gmra.mrb[14].mxu1 %vm255_vm3, %v1338_v32  ;;  %v2502_v32 = vpack.c.bf16 %v1552_v31, %v1551_v29  ;;  %v2526_v29 = vpack.c.bf16 %v1796_v28, %v1795_v27 }
0x10b6   :  { %v2328_v33 = vpop.f32.mrb[12].mxu1 }
0x10b7   :  { %v1223_v34 = vmul.f32 0.25, %v2328_v33  ;;  %v1213_v35 = vpop.f32.mrb[13].mxu1 }
0x10b8   :  { %v1222_v36 = vmul.f32 0.25, %v1213_v35 }
0x10b9   :  { %v1225_v37 = vadd.f32 %v1223_v34, %v2786_v4 }
0x10ba   :  { %v1224_v38 = vadd.f32 %v1222_v36, %v2791_v7 }
0x10bb   :  { %v1229_v39 = vsel %vm255_vm3, %v1225_v37, -inf }
0x10bc   :  { %1230 = vmax.xlane.f32.xlu0 %v1229_v39  ;;  %v1226_v55 = vsel %vm255_vm3, %v1224_v38, -inf }
0x10bd   :  { %1227 = vmax.xlane.f32.xlu1 %v1226_v55 }
0x10be   :  { %v2342_v1 = vpop.f32.mrb[14].mxu1 }
0x10bf   :  { %v1427_v53 = vmul.f32 0.25, %v2342_v1  ;;  %v1417_v40 = vpop.f32.mrb[15].mxu1  ;;  %v2104_v1 = vld [vmem:[%s3103_s1 + $0x178] ss:$0 sm:$0xff] }
0x10c0   :  { %v1426_v41 = vmul.f32 0.25, %v1417_v40 }
0x10c1   :  { %v1429_v42 = vadd.f32 %v1427_v53, %v2786_v4 }
0x10c2   :  { %v1428_v43 = vadd.f32 %v1426_v41, %v2791_v7 }
0x10c3   :  { %v1433_v44 = vsel %vm255_vm3, %v1429_v42, -inf }
0x10c4   :  { %1434 = vmax.xlane.f32.xlu1 %v1433_v44  ;;  %v1430_v45 = vsel %vm255_vm3, %v1428_v43, -inf }
0x10c5   :  { %1431 = vmax.xlane.f32.xlu0 %v1430_v45 }
0x1149   :  { %v1231_v46 = vpop.xlane.xlu0 %1230 }
0x114a   :  { %v1233_v47 = vsub.f32 %v1225_v37, %v1231_v46  ;;  %v1228_v48 = vpop.xlane.xlu1 %1227 }
0x114b   :  { %v1232_v49 = vsub.f32 %v1224_v38, %v1228_v48 }
0x114c   :  { %v1236_v50 = vmul.f32 1.442695, %v1233_v47 }
0x114d   :  { %v1234_v51 = vmul.f32 1.442695, %v1232_v49 }
0x114e   :  { %2622 = vpow2.f32 %v1236_v50 }
0x114f   :  { %2624 = vpow2.f32 %v1234_v51 }
0x1151   :  { %v1435_v52 = vpop.xlane.xlu1 %1434 }
0x1152   :  { %v1437_v54 = vsub.f32 %v1429_v42, %v1435_v52  ;;  %v1432_v56 = vpop.xlane.xlu0 %1431 }
0x1153   :  { %v1436_v4 = vsub.f32 %v1428_v43, %v1432_v56 }
0x1154   :  { %v1440_v57 = vmul.f32 1.442695, %v1437_v54 }
0x1155   :  { %v1438_v7 = vmul.f32 1.442695, %v1436_v4 }
0x1156   :  { %2626 = vpow2.f32 %v1440_v57  ;;  %v1682_v57 = vld [vmem:[%s3103_s1 + $0x198] sm:$0xff] }
0x1157   :  { %2628 = vpow2.f32 %v1438_v7 }
0x1158   :  { %v2623_v58 = vpop.eup %2622 }
0x1159   :  { %v2625_v59 = vpop.eup %2624  ;;  %v1241_v60 = vsel %vm255_vm3, %v2623_v58, 0.0 }
0x115a   :  { %1242 = vadd.xlane.f32.xlu1 %v1241_v60  ;;  %v1238_v62 = vsel %vm255_vm3, %v2625_v59, 0.0 }
0x115b   :  { %1239 = vadd.xlane.f32.xlu0 %v1238_v62 }
0x1160   :  { %v2627_v63 = vpop.eup %2626 }
0x1161   :  { %v2629_v0 = vpop.eup %2628  ;;  %v1445_v61 = vsel %vm255_vm3, %v2627_v63, 0.0 }
0x1162   :  { %1446 = vadd.xlane.f32.xlu1 %v1445_v61  ;;  %v1442_v2 = vsel %vm255_vm3, %v2629_v0, 0.0 }
0x1163   :  { %1443 = vadd.xlane.f32.xlu0 %v1442_v2 }
0x1173   :  { %2586 = vrot.lane.b32.xlu1 %v2939_v22, %s2688_s18 }
0x1179   :  { %2581 = vrot.lane.b32.xlu0 %v2939_v22, %s2686_s16 }
0x11e7   :  { %v1243_v5 = vpop.xlane.xlu1 %1242 }
0x11e8   :  { %v1240_v3 = vpop.xlane.xlu0 %1239 }
0x11e9   :  { %2630 = vrcp.f32 %v1240_v3 }
0x11ea   :  { %2632 = vrcp.f32 %v1243_v5 }
0x11ef   :  { %v1447_v6 = vpop.xlane.xlu1 %1446 }
0x11f0   :  { %v1444_v8 = vpop.xlane.xlu0 %1443 }
0x11f1   :  { %2634 = vrcp.f32 %v1444_v8 }
0x11f2   :  { %2636 = vrcp.f32 %v1447_v6  ;;  %v2107_v6 = vld [vmem:[%s3103_s1 + $0x180] ss:$0 sm:$0xff] }
0x11f3   :  { %v2631_v9 = vpop.eup %2630  ;;  %v2587_v10 = vpop.permute.xlu1 %2586 }
0x11f4   :  { %v2582_v11 = vpop.permute.xlu0 %2581  ;;  %v1246_v12 = vmul.f32 %v2631_v9, %v2625_v59  ;;  %v2589_v13 = vunpack.i.h.bf16 %v2587_v10  ;;  %v2588_v14 = vunpack.i.l.bf16 %v2587_v10  ;;  %v2633_v20 = vpop.eup %2632  ;;  %v1684_v59 = vld [vmem:[%s3103_s1 + $0x1a8] sm:$0xff] }
0x11f5   :  { %v2584_v17 = vunpack.i.h.bf16 %v2582_v11  ;;  %v2583_v18 = vunpack.i.l.bf16 %v2582_v11  ;;  %v1247_v23 = vmul.f32 %v2633_v20, %v2623_v58  ;;  %v1683_v58 = vld [vmem:[%s3103_s1 + $0x1a0] sm:$0xff]  ;;  %v2108_v11 = vld [vmem:[%s3103_s1 + $0x188] ss:$0 sm:$0xff] }
0x11f6   :  { %2333 = vmatprep.mubr.msk.f32.mxu0 %vm255_vm3, %v1246_v12  ;;  %v2494_v21 = vpack.c.bf16 %v2589_v13, %v2588_v14  ;;  %v2510_v60 = vpack.c.bf16 %v1684_v59, %v1683_v58 }
0x11f7   :  { %v2484_v19 = vpack.c.bf16 %v2584_v17, %v2583_v18  ;;  %v1789_v18 = vld [vmem:[%s3103_s1 + $0x1b8] sm:$0xff] }
0x11f9   :  { %2485 = vmatprep.subr.bf16.mxu0 %v2484_v19 }
0x11fa   :  { %2487 = vmatpush3.bf16.msra.mxu0 %v2484_v19  ;;  %v1790_v19 = vld [vmem:[%s3103_s1 + $0x1c0] sm:$0xff] }
0x11fb   :  { %v2635_v22 = vpop.eup %2634  ;;  %2495 = vmatprep.subr.bf16.mxu0 %v2494_v21  ;;  %v2514_v20 = vpack.c.bf16 %v1790_v19, %v1789_v18 }
0x11fc   :  { %v2637_v24 = vpop.eup %2636  ;;  %v1450_v25 = vmul.f32 %v2635_v22, %v2629_v0  ;;  %v1792_v22 = vld [vmem:[%s3103_s1 + $0x1d0] sm:$0xff] }
0x11fd   :  { %2334 = vmatmul.mubr.msk.f32.vlgmr.msra.gmra.mrb[8].mxu0 %vm255_vm3, %v1247_v23  ;;  %v1451_v26 = vmul.f32 %v2637_v24, %v2627_v63  ;;  %v1793_v23 = vld [vmem:[%s3103_s1 + $0x1d8] sm:$0xff] }
0x11fe   :  { %2497 = vmatpush3.bf16.msra.mxu0 %v2494_v21  ;;  %2347 = vmatprep.mubr.msk.f32.mxu0 %vm255_vm3, %v1450_v25  ;;  %v1791_v21 = vld [vmem:[%s3103_s1 + $0x1c8] sm:$0xff]  ;;  %v1794_v25 = vld [vmem:[%s3103_s1 + $0x1e0] sm:$0xff] }
0x11ff   :  { %2499 = vmatprep.subr.bf16.mxu0 %v2498_v30  ;;  %v2518_v24 = vpack.c.bf16 %v1792_v22, %v1791_v21  ;;  %v2115_v21 = vld [vmem:[%s3103_s1 + $0x200] ss:$0 sm:$0xff] }
0x1201   :  { %2348 = vmatmul.mubr.msk.f32.vlgmr.msra.gmra.mrb[10].mxu0 %vm255_vm3, %v1451_v26  ;;  %v2522_v26 = vpack.c.bf16 %v1794_v25, %v1793_v23  ;;  %v2116_v25 = vld [vmem:[%s3103_s1 + $0x208] ss:$0 sm:$0xff] }
0x1202   :  { %2501 = vmatpush3.bf16.msra.mxu0 %v2498_v30  ;;  %v2109_v30 = vld [vmem:[%s3103_s1 + $0x1b0] ss:$0 sm:$0xff] }
0x1203   :  { %2503 = vmatprep.subr.bf16.mxu0 %v2502_v32 }
0x1206   :  { %2505 = vmatpush3.bf16.msra.mxu0 %v2502_v32 }
0x1207   :  { %2515 = vmatprep.subr.bf16.mxu0 %v2514_v20 }
0x12d0   :  { %v2335_v33 = vpop.f32.mrb[8].mxu0 }
0x12d1   :  { %v1326_v34 = vpop.f32.mrb[9].mxu0 }
0x12d4   :  { %v2349_v35 = vpop.f32.mrb[10].mxu0 }
0x12d5   :  { %1543 = vrot.lane.b32.xlu0 %v2349_v35, %s2689_s26  ;;  %v1530_v36 = vpop.f32.mrb[11].mxu0 }
0x12d6   :  { %1541 = vrot.lane.b32.xlu1 %v1530_v36, %s2689_s26 }
0x1347   :  { %v1544_v37 = vpop.permute.xlu0 %1543 }
0x1348   :  { %v1542_v38 = vpop.permute.xlu1 %1541  ;;  %v1548_v55 = vsel %vm255_vm3, %v2335_v33, %v1544_v37 }
0x1349   :  { %v1547_v39 = vsel %vm255_vm3, %v1326_v34, %v1542_v38 }
0x134a   :  { %2358 = vmatprep.mubr.msk.f32.mxu0 %vm34_vm0, %v1547_v39 }
0x134b   :  { %2359 = vmatmul.mubr.msk.f32.vlgmr.msra.gmra.mrb[12].mxu0 %vm34_vm0, %v1548_v55 }
0x134c   :  { %2517 = vmatpush3.bf16.msra.mxu0 %v2514_v20 }
0x134d   :  { %2519 = vmatprep.subr.bf16.mxu0 %v2518_v24 }
0x1350   :  { %2521 = vmatpush3.bf16.msra.mxu0 %v2518_v24 }
0x1351   :  { %2523 = vmatprep.subr.bf16.mxu0 %v2522_v26 }
0x1354   :  { %2525 = vmatpush3.bf16.msra.mxu0 %v2522_v26 }
0x1355   :  { %2527 = vmatprep.subr.bf16.mxu0 %v2526_v29 }
0x1358   :  { %2529 = vmatpush3.bf16.msra.mxu0 %v2526_v29 }
0x141e   :  { %v2360_v53 = vpop.f32.mrb[12].mxu0 }
0x141f   :  { %v1636_v40 = vadd.f32 %v2360_v53, %v2104_v1  ;;  %v1630_v41 = vpop.f32.mrb[13].mxu0 }
0x1420   :  { %v1631_v42 = vadd.f32 %v2104_v1, %v1630_v41 }
0x1421   :  { %v1640_v43 = vadd.f32 %v1636_v40, %v2929_v16 }
0x1422   :  { %v1639_v44 = vadd.f32 %v1631_v42, %v2927_v15  ;;  %v1681_v15 = vld [vmem:[%s3103_s1 + $0x190] sm:$0xff] }
0x1423   :  { %v1646_v45 = vsel %vm34_vm0, %v1640_v43, 0.0  ;;  %v2506_v7 = vpack.c.bf16 %v1682_v57, %v1681_v15 }
0x1424   :  { %1647 = vadd.xlane.f32.xlu0 %v1646_v45  ;;  %v1643_v46 = vsel %vm34_vm0, %v1639_v44, 0.0 }
0x1425   :  { %1644 = vadd.xlane.f32.xlu1 %v1643_v46  ;;  %2507 = vmatprep.subr.bf16.mxu1 %v2506_v7 }
0x1426   :  { %2509 = vmatpush3.bf16.msra.mxu1 %v2506_v7 }
0x1427   :  { %2511 = vmatprep.subr.bf16.mxu1 %v2510_v60 }
0x142a   :  { %2513 = vmatpush3.bf16.msra.mxu1 %v2510_v60 }
0x14b1   :  { %v1648_v47 = vpop.xlane.xlu0 %1647 }
0x14b2   :  { %v1650_v48 = vmul.f32 0.03125, %v1648_v47  ;;  %v1645_v49 = vpop.xlane.xlu1 %1644 }
0x14b3   :  { %v1649_v50 = vmul.f32 0.03125, %v1645_v49 }
0x14b4   :  { %v1652_v51 = vsub.f32 %v1640_v43, %v1650_v48 }
0x14b5   :  { %v1651_v52 = vsub.f32 %v1639_v44, %v1649_v50  ;;  %v2112_v50 = vld [vmem:[%s3103_s1 + $0x1f8] ss:$0 sm:$0xff] }
0x14b6   :  { %v1654_v54 = vmul.f32 %v1652_v51, %v1652_v51 }
0x14b7   :  { %v1653_v56 = vmul.f32 %v1651_v52, %v1651_v52 }
0x14b8   :  { %v1658_v4 = vsel %vm34_vm0, %v1654_v54, 0.0 }
0x14b9   :  { %1659 = vadd.xlane.f32.xlu1 %v1658_v4  ;;  %v1655_v16 = vsel %vm34_vm0, %v1653_v56, 0.0 }
0x14ba   :  { %1656 = vadd.xlane.f32.xlu0 %v1655_v16 }
0x1546   :  { %v1660_v62 = vpop.xlane.xlu1 %1659 }
0x1547   :  { %v1662_v63 = vmul.f32 0.03125, %v1660_v62  ;;  %v1657_v0 = vpop.xlane.xlu0 %1656 }
0x1548   :  { %v1661_v61 = vmul.f32 0.03125, %v1657_v0 }
0x1549   :  { %v1664_v2 = vadd.f32 1e-12, %v1662_v63 }
0x154a   :  { %v1663_v3 = vadd.f32 1e-12, %v1661_v61 }
0x154b   :  { %2638 = vrsqrt.f32 %v1664_v2 }
0x154c   :  { %2640 = vrsqrt.f32 %v1663_v3 }
0x1555   :  { %v2639_v5 = vpop.eup %2638 }
0x1556   :  { %v2641_v8 = vpop.eup %2640  ;;  %v1668_v9 = vmul.f32 %v2639_v5, %v1652_v51  ;;  %v1925_v5 = vld [vmem:[%s3103_s1 + $0x210] sm:$0xff] }
0x1557   :  { %v1667_v10 = vmul.f32 %v2641_v8, %v1651_v52 }
0x1558   :  { %v1674_v12 = vmul.f32 %v2107_v6, %v1668_v9  ;;  %v1927_v9 = vld [vmem:[%s3103_s1 + $0x220] sm:$0xff] }
0x1559   :  { %v1673_v13 = vmul.f32 %v2107_v6, %v1667_v10  ;;  %v1926_v6 = vld [vmem:[%s3103_s1 + $0x218] sm:$0xff]  ;;  %v1928_v10 = vld [vmem:[%s3103_s1 + $0x228] sm:$0xff] }
0x155a   :  { %v1680_v17 = vadd.f32 %v2108_v11, %v1674_v12  ;;  %v2530_v8 = vpack.c.bf16 %v1926_v6, %v1925_v5 }
0x155b   :  { %v1679_v14 = vadd.f32 %v2108_v11, %v1673_v13  ;;  %v2534_v11 = vpack.c.bf16 %v1928_v10, %v1927_v9 }
0x155c   :  { %2531 = vmatprep.subr.bf16.mxu1 %v2530_v8 }
0x155d   :  { %2369 = vmatprep.mubr.msk.f32.mxu1 %vm34_vm0, %v1679_v14 }
0x155e   :  { %2370 = vmatmul.mubr.msk.f32.vlgmr.msra.gmra.mrb[16].mxu1 %vm34_vm0, %v1680_v17 }
0x155f   :  { %2533 = vmatpush3.bf16.msra.mxu1 %v2530_v8 }
0x1560   :  { %2535 = vmatprep.subr.bf16.mxu1 %v2534_v11 }
0x1563   :  { %2537 = vmatpush3.bf16.msra.mxu1 %v2534_v11 }
0x1631   :  { %v2371_v31 = vpop.f32.mrb[16].mxu1 }
0x1632   :  { %v1768_v32 = vadd.f32 %v2371_v31, %v2109_v30  ;;  %v1762_v33 = vpop.f32.mrb[17].mxu1 }
0x1633   :  { %v1763_v34 = vadd.f32 %v2109_v30, %v1762_v33  ;;  %v2117_v30 = vld [vmem:[%s3103_s1 + $0x230] ss:$0 sm:$0xff]  ;;  %s2690_s1 = smov [#allocation2]  }
0x1634   :  { %v1774_v35 = vmul.f32 0.044715, %v1768_v32  ;;  %v1772_v47 = vmul.f32 0.5, %v1768_v32  ;;  %s2044_s27 = sshll.u32 %s2690_s1, 4  ;;  %s2045_s27 = int_to_ptr.vmem [resolvable:$true] %s2044_s27 }
0x1635   :  { %v1773_v36 = vmul.f32 0.044715, %v1763_v34  ;;  %v1771_v45 = vmul.f32 0.5, %v1763_v34  ;;  %s2658_s28 = scalar_lea.vmem %s2045_s27, 256  ;;  %p2663_p1 = scmp.lt.s32.totalorder %s2045_s27, %s2045_s27 }
0x1636   :  { %v1776_v37 = vmul.f32 %v1774_v35, %v1768_v32  ;;  %p2659_p0 = scmp.ne.s32.totalorder %s2045_s27, %s2658_s28  ;;  %p2664_p2 = scmp.lt.s32.totalorder %s2658_s28, %s2658_s28 }
0x1637   :  { %v1775_v38 = vmul.f32 %v1773_v36, %v1763_v34 }
0x1638   :  { %v1778_v39 = vmul.f32 %v1776_v37, %v1768_v32  ;;  %p2665_p3 = por %p2664_p2, %p2663_p1 }
0x1639   :  { %v1777_v55 = vmul.f32 %v1775_v38, %v1763_v34 }
0x163a   :  { %v1780_v1 = vadd.f32 %v1778_v39, %v1768_v32  ;;  %p2666_p4 = pnand %p2665_p3, %p2659_p0 }
0x163b   :  { %v1779_v53 = vadd.f32 %v1777_v55, %v1763_v34 }
0x163c   :  { %v1782_v40 = vmul.f32 0.7978846, %v1780_v1 }
0x163d   :  { %v1781_v41 = vmul.f32 0.7978846, %v1779_v53 }
0x163e   :  { %2642 = vtanh.f32 %v1782_v40 }
0x163f   :  { %2644 = vtanh.f32 %v1781_v41 }
0x1648   :  { %v2643_v42 = vpop.eup %2642 }
0x1649   :  { %v2645_v43 = vpop.eup %2644  ;;  %v1786_v44 = vadd.f32 1.0, %v2643_v42 }
0x164a   :  { %v1785_v46 = vadd.f32 1.0, %v2645_v43 }
0x164b   :  { %v1788_v49 = vmul.f32 %v1786_v44, %v1772_v47 }
0x164c   :  { %v1787_v48 = vmul.f32 %v1785_v46, %v1771_v45 }
0x164e   :  { %2388 = vmatprep.mubr.msk.f32.mxu0 %vm919_vm5, %v1787_v48 }
0x164f   :  { %2389 = vmatmul.mubr.msk.f32.vlgmr.msra.gmra.mrb[14].mxu0 %vm919_vm5, %v1788_v49 }
0x1722   :  { %v2390_v51 = vpop.f32.mrb[14].mxu0 }
0x1723   :  { %v1880_v52 = vadd.f32 %v2390_v51, %v2112_v50  ;;  %v1874_v54 = vpop.f32.mrb[15].mxu0 }
0x1724   :  { %v1875_v56 = vadd.f32 %v2112_v50, %v1874_v54 }
0x1725   :  { %v1884_v4 = vadd.f32 %v1880_v52, %v1680_v17 }
0x1726   :  { %v1883_v16 = vadd.f32 %v1875_v56, %v1679_v14 }
0x1727   :  { %v1890_v15 = vsel %vm34_vm0, %v1884_v4, 0.0 }
0x1728   :  { %1891 = vadd.xlane.f32.xlu1 %v1890_v15  ;;  %v1887_v57 = vsel %vm34_vm0, %v1883_v16, 0.0 }
0x1729   :  { %1888 = vadd.xlane.f32.xlu0 %v1887_v57 }
0x17b5   :  { %v1892_v7 = vpop.xlane.xlu1 %1891 }
0x17b6   :  { %v1894_v58 = vmul.f32 0.03125, %v1892_v7  ;;  %v1889_v59 = vpop.xlane.xlu0 %1888 }
0x17b7   :  { %v1893_v60 = vmul.f32 0.03125, %v1889_v59 }
0x17b8   :  { %v1896_v62 = vsub.f32 %v1884_v4, %v1894_v58 }
0x17b9   :  { %v1895_v63 = vsub.f32 %v1883_v16, %v1893_v60 }
0x17ba   :  { %v1898_v0 = vmul.f32 %v1896_v62, %v1896_v62 }
0x17bb   :  { %v1897_v61 = vmul.f32 %v1895_v63, %v1895_v63 }
0x17bc   :  { %v1902_v2 = vsel %vm34_vm0, %v1898_v0, 0.0 }
0x17bd   :  { %1903 = vadd.xlane.f32.xlu1 %v1902_v2  ;;  %v1899_v3 = vsel %vm34_vm0, %v1897_v61, 0.0 }
0x17be   :  { %1900 = vadd.xlane.f32.xlu0 %v1899_v3 }
0x184a   :  { %v1904_v12 = vpop.xlane.xlu1 %1903 }
0x184b   :  { %v1906_v13 = vmul.f32 0.03125, %v1904_v12  ;;  %v1901_v14 = vpop.xlane.xlu0 %1900 }
0x184c   :  { %v1905_v17 = vmul.f32 0.03125, %v1901_v14 }
0x184d   :  { %v1908_v18 = vadd.f32 1e-12, %v1906_v13 }
0x184e   :  { %v1907_v19 = vadd.f32 1e-12, %v1905_v17 }
0x184f   :  { %2646 = vrsqrt.f32 %v1908_v18 }
0x1850   :  { %2648 = vrsqrt.f32 %v1907_v19 }
0x1859   :  { %v2647_v20 = vpop.eup %2646 }
0x185a   :  { %v2649_v22 = vpop.eup %2648  ;;  %v1912_v23 = vmul.f32 %v2647_v20, %v1896_v62 }
0x185b   :  { %v1911_v24 = vmul.f32 %v2649_v22, %v1895_v63 }
0x185c   :  { %v1918_v26 = vmul.f32 %v2115_v21, %v1912_v23 }
0x185d   :  { %v1917_v27 = vmul.f32 %v2115_v21, %v1911_v24 }
0x185e   :  { %v1924_v29 = vadd.f32 %v2116_v25, %v1918_v26 }
0x185f   :  { %v1923_v28 = vadd.f32 %v2116_v25, %v1917_v27 }
0x1861   :  { %2399 = vmatprep.mubr.msk.f32.mxu1 %vm34_vm0, %v1923_v28 }
0x1862   :  { %2400 = vmatmul.mubr.msk.f32.vlgmr.msra.gmra.mrb[18].mxu1 %vm34_vm0, %v1924_v29 }
0x1935   :  { %v2401_v31 = vpop.f32.mrb[18].mxu1 }
0x1936   :  { %v2012_v32 = vadd.f32 %v2401_v31, %v2117_v30  ;;  %v2006_v33 = vpop.f32.mrb[19].mxu1 }
0x1937   :  { %v2007_v34 = vadd.f32 %v2117_v30, %v2006_v33 }
0x1938   :  { %v2018_v35 = vsel %vm34_vm0, %v2012_v32, -inf }
0x1939   :  { %2019 = vmax.xlane.f32.xlu1 %v2018_v35  ;;  %v2015_v36 = vsel %vm34_vm0, %v2007_v34, -inf }
0x193a   :  { %2016 = vmax.xlane.f32.xlu0 %v2015_v36 }
0x19c6   :  { %v2020_v37 = vpop.xlane.xlu1 %2019 }
0x19c7   :  { %v2022_v38 = vsub.f32 %v2012_v32, %v2020_v37  ;;  %v2017_v39 = vpop.xlane.xlu0 %2016 }
0x19c8   :  { %v2021_v55 = vsub.f32 %v2007_v34, %v2017_v39 }
0x19c9   :  { %v2025_v1 = vmul.f32 1.442695, %v2022_v38 }
0x19ca   :  { %v2023_v53 = vmul.f32 1.442695, %v2021_v55 }
0x19cb   :  { %2650 = vpow2.f32 %v2025_v1 }
0x19cc   :  { %2652 = vpow2.f32 %v2023_v53 }
0x19d5   :  { %v2651_v40 = vpop.eup %2650 }
0x19d6   :  { %v2653_v41 = vpop.eup %2652  ;;  %v2030_v42 = vsel %vm34_vm0, %v2651_v40, 0.0 }
0x19d7   :  { %2031 = vadd.xlane.f32.xlu1 %v2030_v42  ;;  %v2027_v43 = vsel %vm34_vm0, %v2653_v41, 0.0 }
0x19d8   :  { %2028 = vadd.xlane.f32.xlu0 %v2027_v43 }
0x1a64   :  { %v2032_v44 = vpop.xlane.xlu1 %2031 }
0x1a65   :  { %2654 = vrcp.f32 %v2032_v44  ;;  %v2029_v45 = vpop.xlane.xlu0 %2028 }
0x1a66   :  { %2656 = vrcp.f32 %v2029_v45 }
0x1a6f   :  { %v2655_v46 = vpop.eup %2654 }
0x1a70   :  { %v2657_v47 = vpop.eup %2656  ;;  %v2036_v48 = vmul.f32 %v2655_v46, %v2651_v40 }
0x1a71   :  { %v2034_v49 = vmul.f32 %v2657_v47, %v2653_v41 }
0x1a72   :  { %2038 = vst.msk [vmem:[#allocation2 + $0x8] sm:$0xff] %vm34_vm0, %v2036_v48 }
0x1a73   :  { %2037 = vst.msk [vmem:[#allocation2] sm:$0xff] %vm34_vm0, %v2034_v49 }
0x1a74   :  { %2669 = shalt.err (!%p2666_p4)
}
0x1a75   :  { %s2670_s16 = scalar_lea.hbm %s3104_s2, 256 }
0x1a76   :  { %p2671_p5 = scmp.ne.s32.totalorder %s3104_s2, %s2670_s16  ;;  %p2674_p6 = scmp.lt.u32.totalorder %s2670_s16, %s3104_s2 }
0x1a78   :  { %p2676_p7 = pnand %p2674_p6, %p2671_p5 }
0x1a7a   :  { %2679 = shalt.err (!%p2676_p7)
}
0x1a7b   :  { %s2691_s3 = smov 128   ;;  %s2692_s4 = smov 8  }
0x1a7c   :  { %2050 = dma.vmem_to_hbm [thread:$0]  %s2045_s27, 256, %s3104_s2, [#allocation3], %s2691_s3, %s2691_s3, %s2692_s4  }
0x1a7d   :  { %2680 = dma.done.wait [#allocation3], 256  }
0x1a7e   :  { %2681 = vsyncadd [#allocation3], 4294967040 }
0x1a7f   :  { %2054 = vsyncpa [#allocation3], 1 }

</bundles_post_ra>
